<compile_context>
chip_gen: v6e
topology: v6e:2x2x1
jax: 0.10.0
libtpu: 0.0.40
codegen_flags: <defaults>
</compile_context>

<pallas_src>
import functools

import jax
import jax.numpy as jnp
import numpy as np
from jax.experimental import pallas as pl
from jax.experimental.pallas import tpu as pltpu


# --------------------------------------------------------------------------
# Fused Pallas kernel: weight CNN (2x conv3x3 'same') + NLM aggregation.
# --------------------------------------------------------------------------
def _nlm_cnn_fused_kernel(x_ref, mask_ref, w1t_ref, b1_ref, w2t_ref, b2_ref,
                          o_ref, xcnn_scr, h_scr, wmap_scr,
                          *, K, Wp, Q, M, c0, sar_data, mxu_dtype):
    """One batch element, everything resident in VMEM.

    Layout convention: every 'plane' buffer stores the zero-padded image
    (Hp x Wp, Hp = H + 2, Wp = W + 2) flattened to p = row * Wp + col at
    buffer index p + M (M = 128-aligned left margin).  Every conv / NLM tap
    below is therefore a single static lane-offset load of a (rows, Q) slab
    with Q a multiple of 128 — lane-dense MXU operands, no per-row copies.
    """
    Cin = x_ref.shape[1]

    mask = mask_ref[...]                       # (1, Q): 1 inside H x W, else 0

    # Hygiene: scratch margins/tails only ever feed ring outputs that are
    # cropped away, but keep them finite/deterministic.
    h_scr[...] = jnp.zeros(h_scr.shape, jnp.float32)
    wmap_scr[...] = jnp.zeros(wmap_scr.shape, jnp.float32)

    def x_tap(d):                              # x[p + d]  -> one (Cin, Q) vld
        return x_ref[0, :, M + d:M + d + Q]

    def h_tap(d):                              # h[p + d]  -> one (F1, Q) vld
        return h_scr[:, M + d:M + d + Q]

    # ---- CNN input (SAR data -> log amplitude; conv halo ring stays 0) -----
    if sar_data:
        xcnn_scr[...] = jnp.zeros(xcnn_scr.shape, jnp.float32)
        xcnn_scr[:, M:M + Q] = jnp.where(
            mask > 0.0, jnp.log(jnp.abs(x_tap(0))) * 0.5, 0.0)

        def cnn_tap(d):
            return xcnn_scr[:, M + d:M + d + Q]
    else:
        cnn_tap = x_tap

    conv_offsets = [(dy - 1) * Wp + (dx - 1)
                    for dy in range(3) for dx in range(3)]

    # ---- layer 1: 3x3 'same' conv + bias + ReLU as ONE plane-wide matmul ---
    # im2col rows ordered (ky, kx, cin) to match w1.reshape(9*Cin, F1).T.
    a1 = jnp.concatenate([cnn_tap(d) for d in conv_offsets], axis=0)
    h = jnp.dot(w1t_ref[...], a1.astype(mxu_dtype),
                preferred_element_type=jnp.float32)          # (F1, Q), f32 acc
    h = jnp.maximum(h + b1_ref[...], 0.0) * mask             # zero 'same' ring
    h_scr[:, M:M + Q] = h                                    # aligned store

    # ---- layer 2: 3x3 'same' conv + bias -> K*K-channel NLM weight map -----
    a2 = jnp.concatenate([h_tap(d) for d in conv_offsets], axis=0)
    wmap = jnp.dot(w2t_ref[...], a2.astype(mxu_dtype),
                   preferred_element_type=jnp.float32) + b2_ref[...]
    wmap_scr[:, M:M + Q] = wmap                              # stays in VMEM

    # ---- NLM aggregation:  y[p] = sum_{a,b} x[p + a*Wp + b] * w[aK+b, p+c0]
    # (c0 = centre-crop offset of the weight map).  Elementwise math is f32
    # on all generations; the K*K weight map never touches HBM.
    wsh = wmap_scr[:, M + c0:M + c0 + Q]                     # (KK, Q), one vld
    acc = jnp.zeros((Cin, Q), jnp.float32)
    for a in range(K):                                       # K*K taps, unrolled
        for b in range(K):
            kk = a * K + b
            acc = acc + x_tap(a * Wp + b) * wsh[kk:kk + 1, :]
    o_ref[0] = acc.astype(o_ref.dtype)                       # lane-dense store


# --------------------------------------------------------------------------
# Wrapper
# --------------------------------------------------------------------------
def _round_up(v, m):
    return (v + m - 1) // m * m


def nlm_cnn_forward(x, params, sizearea, sar_data=False, padding=False,
                    mxu_dtype=jnp.bfloat16):
    """Equivalent of NlmCNN.forward(x), fully fused in one Pallas TPU kernel.

    mxu_dtype=jnp.bfloat16 (default) feeds the conv matmuls bf16 operands with
    f32 accumulation (MXU-native on v5e/v6e/v7x); use jnp.float32 for exact
    parity with the f32 reference.
    """
    # `padding` is a no-op for stride=1 (pad amounts -(H-K) % 1 are always 0);
    # kept only for API parity with the PyTorch module.
    del padding

    N, Cin, H, W = x.shape
    K = int(sizearea)
    if K % 2 != 1:
        raise ValueError("sizearea must be odd (as the PyTorch module requires)")
    KK = K * K
    F1 = params["w1"].shape[-1]
    assert params["w1"].shape == (3, 3, Cin, F1)
    assert params["w2"].shape == (3, 3, F1, KK)

    Ho, Wo = H - K + 1, W - K + 1
    pr = pc = (K - 1) // 2                 # centre-crop offset of the weight map
    Hp, Wp = H + 2, W + 2                  # 3x3 'same' halo (1 px per side)
    P = Hp * Wp                            # true padded-plane length
    Q = _round_up(P, 128)                  # lane-dense compute width (>=128)
    M = _round_up(Wp + 1, 128)             # 128-aligned left margin (covers the
                                           # most-negative conv tap; stores stay aligned)
    D = max((K - 1) * (Wp + 1), Wp + 1)    # largest positive tap / crop offset
    B = _round_up(M + D + Q, 128)          # flat input-buffer width

    # Wrapper-side glue: one small pass building the padded flat input buffer.
    xp = jnp.pad(x.astype(jnp.float32), ((0, 0), (0, 0), (1, 1), (1, 1)))
    xbuf = jnp.pad(xp.reshape(N, Cin, P), ((0, 0), (0, 0), (M, B - M - P)))

    # Interior mask over the compute width: 1 inside the H x W image, 0 on the
    # conv halo ring and on the 128-alignment tail.
    q = np.arange(Q)
    r, c = q // Wp, q % Wp
    interior = (q < P) & (r >= 1) & (r <= H) & (c >= 1) & (c <= W)
    mask = jnp.asarray(interior.astype(np.float32)[None, :])          # (1, Q)

    w1t = params["w1"].reshape(9 * Cin, F1).T.astype(mxu_dtype)       # (F1, 9*Cin)
    b1c = params["b1"].reshape(F1, 1).astype(jnp.float32)
    w2t = params["w2"].reshape(9 * F1, KK).T.astype(mxu_dtype)        # (KK, 9*F1)
    b2c = params["b2"].reshape(KK, 1).astype(jnp.float32)

    kernel = functools.partial(
        _nlm_cnn_fused_kernel, K=K, Wp=Wp, Q=Q, M=M, c0=pr * Wp + pc,
        sar_data=sar_data, mxu_dtype=mxu_dtype)

    flops = 2 * N * Q * (9 * Cin * F1 + 9 * F1 * KK + KK * Cin)
    transcendentals = N * Cin * Q if sar_data else 0
    bytes_accessed = 4 * (N * Cin * (B + Q) + Q
                          + 9 * Cin * F1 + F1 + 9 * F1 * KK + KK)

    y_flat = pl.pallas_call(
        kernel,
        out_shape=jax.ShapeDtypeStruct((N, Cin, Q), jnp.float32),
        grid=(N,),
        in_specs=[
            pl.BlockSpec((1, Cin, B), lambda n: (n, 0, 0)),
            pl.BlockSpec((1, Q), lambda n: (0, 0)),
            pl.BlockSpec((F1, 9 * Cin), lambda n: (0, 0)),
            pl.BlockSpec((F1, 1), lambda n: (0, 0)),
            pl.BlockSpec((KK, 9 * F1), lambda n: (0, 0)),
            pl.BlockSpec((KK, 1), lambda n: (0, 0)),
        ],
        out_specs=pl.BlockSpec((1, Cin, Q), lambda n: (n, 0, 0)),
        scratch_shapes=[
            pltpu.VMEM((Cin, B), jnp.float32),   # SAR log-amplitude CNN input
            pltpu.VMEM((F1, B), jnp.float32),    # zero-ringed conv1 output
            pltpu.VMEM((KK, B), jnp.float32),    # K*K-channel NLM weight map
        ],
        compiler_params=pltpu.CompilerParams(
            dimension_semantics=("parallel",),        # megacore over batch
            vmem_limit_bytes=32 * 1024 * 1024),       # fits v7x's 64 MiB VMEM
        cost_estimate=pl.CostEstimate(flops=flops,
                                      transcendentals=transcendentals,
                                      bytes_accessed=bytes_accessed),
    )(xbuf, mask, w1t, b1c, w2t, b2c)

    # One cheap XLA slice: drop the halo ring and the alignment tail.
    y = y_flat[:, :, :P].reshape(N, Cin, Hp, Wp)[:, :, 1:1 + Ho, 1:1 + Wo]
    return y


# --------------------------------------------------------------------------
# Deterministic parameter init (synthetic "network_weights" module)
# --------------------------------------------------------------------------
def init_params(key, cin, hidden, sizearea):
    k1, k2, k3, k4 = jax.random.split(key, 4)
    return {
        "w1": 0.1 * jax.random.normal(k1, (3, 3, cin, hidden), jnp.float32),
        "b1": 0.1 * jax.random.normal(k2, (hidden,), jnp.float32),
        "w2": 0.1 * jax.random.normal(k3, (3, 3, hidden, sizearea * sizearea),
                                      jnp.float32),
        "b2": 0.1 * jax.random.normal(k4, (sizearea * sizearea,), jnp.float32),
    }


# --------------------------------------------------------------------------
# Pure-JAX reference (validation only)
# --------------------------------------------------------------------------
def reference_forward(x, params, K, sar_data=False):
    def conv(x_nchw, w_hwio, b, relu):
        w_oihw = jnp.transpose(w_hwio, (3, 2, 0, 1))
        y = jax.lax.conv_general_dilated(
            x_nchw, w_oihw, window_strides=(1, 1), padding="SAME",
            dimension_numbers=("NCHW", "OIHW", "NCHW"))
        y = y + b[None, :, None, None]
        return jnp.maximum(y, 0.0) if relu else y

    x_in = jnp.log(jnp.abs(x)) / 2.0 if sar_data else x
    h = conv(x_in, params["w1"], params["b1"], True)
    w = conv(h, params["w2"], params["b2"], False)
    N, C, H, W = x.shape
    Ho, Wo = H - K + 1, W - K + 1
    pr, pc = (H - Ho) // 2, (W - Wo) // 2
    wc = w[:, :, pr:H - pr, pc:W - pc]                    # (N, K*K, Ho, Wo)
    y = jnp.zeros((N, C, Ho, Wo), jnp.float32)
    for a in range(K):
        for b_ in range(K):
            y = y + x[:, :, a:a + Ho, b_:b_ + Wo] * wc[:, a * K + b_][:, None]
    return y


# --------------------------------------------------------------------------
if __name__ == "__main__":
    key = jax.random.PRNGKey(0)
    kx, kp, kx2, kp2 = jax.random.split(key, 4)

    # Config A: batch=2, 1 channel, 16x16 frames, sizearea=5, hidden=8.
    N, C, H, W = 2, 1, 16, 16
    sizearea, hidden = 5, 8
    x = jax.random.normal(kx, (N, C, H, W), jnp.float32)
    params = init_params(kp, C, hidden, sizearea)
    y_ref = reference_forward(x, params, sizearea)

    # Exact-parity mode (f32 MXU operands).
    y_f32 = jax.block_until_ready(
        nlm_cnn_forward(x, params, sizearea, mxu_dtype=jnp.float32))
    assert y_f32.shape == (N, C, H - sizearea + 1, W - sizearea + 1), y_f32.shape
    np.testing.assert_allclose(np.asarray(y_f32), np.asarray(y_ref),
                               rtol=1e-3, atol=1e-3)

    # Performance mode (bf16 MXU operands, f32 accumulation / f32 NLM math).
    # bf16 operand rounding of the two convs accumulates O(1e-2) differences
    # over the K*K-tap sum, hence the relaxed tolerance here.
    y_bf16 = jax.block_until_ready(
        nlm_cnn_forward(x, params, sizearea, mxu_dtype=jnp.bfloat16))
    assert y_bf16.shape == y_ref.shape
    np.testing.assert_allclose(np.asarray(y_bf16), np.asarray(y_ref),
                               rtol=3e-2, atol=3e-2)

    # Config B: multi-channel input and a different sizearea (exercises the
    # C > 1 broadcast path and the size bookkeeping), f32 parity mode.
    N2, C2, H2, W2, K2, hidden2 = 1, 2, 12, 12, 3, 4
    x2 = jax.random.normal(kx2, (N2, C2, H2, W2), jnp.float32)
    params2 = init_params(kp2, C2, hidden2, K2)
    y2 = jax.block_until_ready(
        nlm_cnn_forward(x2, params2, K2, mxu_dtype=jnp.float32))
    y2_ref = reference_forward(x2, params2, K2)
    assert y2.shape == (N2, C2, H2 - K2 + 1, W2 - K2 + 1), y2.shape
    np.testing.assert_allclose(np.asarray(y2), np.asarray(y2_ref),
                               rtol=1e-3, atol=1e-3)

    print("KERNEL_OK")
</pallas_src>

<mosaic_0001>
module attributes {stable_mosaic.version = 11 : i64} {
  func.func @_nlm_cnn_fused_kernel(%arg0: i32, %arg1: memref<1x1x640xf32, #tpu.memory_space<vmem>>, %arg2: memref<1x384xf32, #tpu.memory_space<vmem>>, %arg3: memref<8x9xf32, #tpu.memory_space<vmem>>, %arg4: memref<8x1xf32, #tpu.memory_space<vmem>>, %arg5: memref<25x72xf32, #tpu.memory_space<vmem>>, %arg6: memref<25x1xf32, #tpu.memory_space<vmem>>, %arg7: memref<1x1x384xf32, #tpu.memory_space<vmem>>, %arg8: memref<1x640xf32, #tpu.memory_space<vmem>>, %arg9: memref<8x640xf32, #tpu.memory_space<vmem>>, %arg10: memref<25x640xf32, #tpu.memory_space<vmem>>) attributes {dimension_semantics = [#tpu.dimension_semantics<parallel>], iteration_bounds = array<i64: 2>, scalar_prefetch = 0 : i64, scratch_operands = 3 : i64, tpu.core_type = #tpu.core_type<tc>, window_params = [{transform_indices = @transform_0, window_bounds = array<i64: 1, 1, 640>}, {pipeline_mode = #tpu.pipeline_mode<synchronous>, transform_indices = @transform_1, window_bounds = array<i64: 1, 384>}, {pipeline_mode = #tpu.pipeline_mode<synchronous>, transform_indices = @transform_2, window_bounds = array<i64: 8, 9>}, {pipeline_mode = #tpu.pipeline_mode<synchronous>, transform_indices = @transform_3, window_bounds = array<i64: 8, 1>}, {pipeline_mode = #tpu.pipeline_mode<synchronous>, transform_indices = @transform_4, window_bounds = array<i64: 25, 72>}, {pipeline_mode = #tpu.pipeline_mode<synchronous>, transform_indices = @transform_5, window_bounds = array<i64: 25, 1>}, {transform_indices = @transform_6, window_bounds = array<i64: 1, 1, 384>}]} {
    %c0 = arith.constant 0 : index
    %c0_0 = arith.constant 0 : index
    %0 = vector.load %arg2[%c0, %c0_0] : memref<1x384xf32, #tpu.memory_space<vmem>>, vector<1x384xf32>
    %cst = arith.constant 0.000000e+00 : f32
    %1 = vector.broadcast %cst : f32 to vector<8x640xf32>
    %c0_1 = arith.constant 0 : index
    %c0_2 = arith.constant 0 : index
    %2 = vector.load %arg9[%c0_1, %c0_2] : memref<8x640xf32, #tpu.memory_space<vmem>>, vector<8x640xf32>
    tpu.vector_store %arg9[%c0_1, %c0_2], %1 {strides = array<i32>} : memref<8x640xf32, #tpu.memory_space<vmem>>, vector<8x640xf32>,
    %cst_3 = arith.constant 0.000000e+00 : f32
    %3 = vector.broadcast %cst_3 : f32 to vector<25x640xf32>
    %c0_4 = arith.constant 0 : index
    %c0_5 = arith.constant 0 : index
    %4 = vector.load %arg10[%c0_4, %c0_5] : memref<25x640xf32, #tpu.memory_space<vmem>>, vector<25x640xf32>
    tpu.vector_store %arg10[%c0_4, %c0_5], %3 {strides = array<i32>} : memref<25x640xf32, #tpu.memory_space<vmem>>, vector<25x640xf32>,
    %c0_6 = arith.constant 0 : index
    %c0_7 = arith.constant 0 : index
    %c109 = arith.constant 109 : index
    %5 = vector.load %arg1[%c0_6, %c0_7, %c109] : memref<1x1x640xf32, #tpu.memory_space<vmem>>, vector<1x1x384xf32>
    %6 = vector.shape_cast %5 : vector<1x1x384xf32> to vector<1x384xf32>
    %c0_8 = arith.constant 0 : index
    %c0_9 = arith.constant 0 : index
    %c110 = arith.constant 110 : index
    %7 = vector.load %arg1[%c0_8, %c0_9, %c110] : memref<1x1x640xf32, #tpu.memory_space<vmem>>, vector<1x1x384xf32>
    %8 = vector.shape_cast %7 : vector<1x1x384xf32> to vector<1x384xf32>
    %c0_10 = arith.constant 0 : index
    %c0_11 = arith.constant 0 : index
    %c111 = arith.constant 111 : index
    %9 = vector.load %arg1[%c0_10, %c0_11, %c111] : memref<1x1x640xf32, #tpu.memory_space<vmem>>, vector<1x1x384xf32>
    %10 = vector.shape_cast %9 : vector<1x1x384xf32> to vector<1x384xf32>
    %c0_12 = arith.constant 0 : index
    %c0_13 = arith.constant 0 : index
    %c127 = arith.constant 127 : index
    %11 = vector.load %arg1[%c0_12, %c0_13, %c127] : memref<1x1x640xf32, #tpu.memory_space<vmem>>, vector<1x1x384xf32>
    %12 = vector.shape_cast %11 : vector<1x1x384xf32> to vector<1x384xf32>
    %c0_14 = arith.constant 0 : index
    %c0_15 = arith.constant 0 : index
    %c128 = arith.constant 128 : index
    %13 = vector.load %arg1[%c0_14, %c0_15, %c128] : memref<1x1x640xf32, #tpu.memory_space<vmem>>, vector<1x1x384xf32>
    %14 = vector.shape_cast %13 : vector<1x1x384xf32> to vector<1x384xf32>
    %c0_16 = arith.constant 0 : index
    %c0_17 = arith.constant 0 : index
    %c129 = arith.constant 129 : index
    %15 = vector.load %arg1[%c0_16, %c0_17, %c129] : memref<1x1x640xf32, #tpu.memory_space<vmem>>, vector<1x1x384xf32>
    %16 = vector.shape_cast %15 : vector<1x1x384xf32> to vector<1x384xf32>
    %c0_18 = arith.constant 0 : index
    %c0_19 = arith.constant 0 : index
    %c145 = arith.constant 145 : index
    %17 = vector.load %arg1[%c0_18, %c0_19, %c145] : memref<1x1x640xf32, #tpu.memory_space<vmem>>, vector<1x1x384xf32>
    %18 = vector.shape_cast %17 : vector<1x1x384xf32> to vector<1x384xf32>
    %c0_20 = arith.constant 0 : index
    %c0_21 = arith.constant 0 : index
    %c146 = arith.constant 146 : index
    %19 = vector.load %arg1[%c0_20, %c0_21, %c146] : memref<1x1x640xf32, #tpu.memory_space<vmem>>, vector<1x1x384xf32>
    %20 = vector.shape_cast %19 : vector<1x1x384xf32> to vector<1x384xf32>
    %c0_22 = arith.constant 0 : index
    %c0_23 = arith.constant 0 : index
    %c147 = arith.constant 147 : index
    %21 = vector.load %arg1[%c0_22, %c0_23, %c147] : memref<1x1x640xf32, #tpu.memory_space<vmem>>, vector<1x1x384xf32>
    %22 = vector.shape_cast %21 : vector<1x1x384xf32> to vector<1x384xf32>
    %23 = tpu.concatenate %6, %8, %10, %12, %14, %16, %18, %20, %22 in 0 : vector<1x384xf32>, vector<1x384xf32>, vector<1x384xf32>, vector<1x384xf32>, vector<1x384xf32>, vector<1x384xf32>, vector<1x384xf32>, vector<1x384xf32>, vector<1x384xf32> -> vector<9x384xf32>
    %c0_24 = arith.constant 0 : index
    %c0_25 = arith.constant 0 : index
    %24 = vector.load %arg3[%c0_24, %c0_25] : memref<8x9xf32, #tpu.memory_space<vmem>>, vector<8x9xf32>
    %cst_26 = arith.constant dense<0.000000e+00> : vector<8x384xf32>
    %25 = tpu.matmul %24, %23, %cst_26 {dimension_numbers = #tpu.dot_dimension_numbers<[1], [0], [0], [1], [0, 0, 1, 1], [], []>} : vector<8x9xf32>, vector<9x384xf32>, vector<8x384xf32> -> vector<8x384xf32>
    %c0_27 = arith.constant 0 : index
    %c0_28 = arith.constant 0 : index
    %26 = vector.load %arg4[%c0_27, %c0_28] : memref<8x1xf32, #tpu.memory_space<vmem>>, vector<8x1xf32>
    %27 = vector.broadcast %26 : vector<8x1xf32> to vector<8x384xf32>
    %28 = arith.addf %25, %27 : vector<8x384xf32>
    %cst_29 = arith.constant 0.000000e+00 : f32
    %29 = vector.broadcast %cst_29 : f32 to vector<8x384xf32>
    %30 = arith.maximumf %28, %29 : vector<8x384xf32>
    %31 = vector.broadcast %0 : vector<1x384xf32> to vector<8x384xf32>
    %32 = arith.mulf %30, %31 : vector<8x384xf32>
    %c0_30 = arith.constant 0 : index
    %c128_31 = arith.constant 128 : index
    %33 = vector.load %arg9[%c0_30, %c128_31] : memref<8x640xf32, #tpu.memory_space<vmem>>, vector<8x384xf32>
    tpu.vector_store %arg9[%c0_30, %c128_31], %32 {strides = array<i32>} : memref<8x640xf32, #tpu.memory_space<vmem>>, vector<8x384xf32>,
    %c0_32 = arith.constant 0 : index
    %c109_33 = arith.constant 109 : index
    %34 = vector.load %arg9[%c0_32, %c109_33] : memref<8x640xf32, #tpu.memory_space<vmem>>, vector<8x384xf32>
    %c0_34 = arith.constant 0 : index
    %c110_35 = arith.constant 110 : index
    %35 = vector.load %arg9[%c0_34, %c110_35] : memref<8x640xf32, #tpu.memory_space<vmem>>, vector<8x384xf32>
    %c0_36 = arith.constant 0 : index
    %c111_37 = arith.constant 111 : index
    %36 = vector.load %arg9[%c0_36, %c111_37] : memref<8x640xf32, #tpu.memory_space<vmem>>, vector<8x384xf32>
    %c0_38 = arith.constant 0 : index
    %c127_39 = arith.constant 127 : index
    %37 = vector.load %arg9[%c0_38, %c127_39] : memref<8x640xf32, #tpu.memory_space<vmem>>, vector<8x384xf32>
    %c0_40 = arith.constant 0 : index
    %c128_41 = arith.constant 128 : index
    %38 = vector.load %arg9[%c0_40, %c128_41] : memref<8x640xf32, #tpu.memory_space<vmem>>, vector<8x384xf32>
    %c0_42 = arith.constant 0 : index
    %c129_43 = arith.constant 129 : index
    %39 = vector.load %arg9[%c0_42, %c129_43] : memref<8x640xf32, #tpu.memory_space<vmem>>, vector<8x384xf32>
    %c0_44 = arith.constant 0 : index
    %c145_45 = arith.constant 145 : index
    %40 = vector.load %arg9[%c0_44, %c145_45] : memref<8x640xf32, #tpu.memory_space<vmem>>, vector<8x384xf32>
    %c0_46 = arith.constant 0 : index
    %c146_47 = arith.constant 146 : index
    %41 = vector.load %arg9[%c0_46, %c146_47] : memref<8x640xf32, #tpu.memory_space<vmem>>, vector<8x384xf32>
    %c0_48 = arith.constant 0 : index
    %c147_49 = arith.constant 147 : index
    %42 = vector.load %arg9[%c0_48, %c147_49] : memref<8x640xf32, #tpu.memory_space<vmem>>, vector<8x384xf32>
    %43 = tpu.concatenate %34, %35, %36, %37, %38, %39, %40, %41, %42 in 0 : vector<8x384xf32>, vector<8x384xf32>, vector<8x384xf32>, vector<8x384xf32>, vector<8x384xf32>, vector<8x384xf32>, vector<8x384xf32>, vector<8x384xf32>, vector<8x384xf32> -> vector<72x384xf32>
    %c0_50 = arith.constant 0 : index
    %c0_51 = arith.constant 0 : index
    %44 = vector.load %arg5[%c0_50, %c0_51] : memref<25x72xf32, #tpu.memory_space<vmem>>, vector<25x72xf32>
    %cst_52 = arith.constant dense<0.000000e+00> : vector<25x384xf32>
    %45 = tpu.matmul %44, %43, %cst_52 {dimension_numbers = #tpu.dot_dimension_numbers<[1], [0], [0], [1], [0, 0, 1, 1], [], []>} : vector<25x72xf32>, vector<72x384xf32>, vector<25x384xf32> -> vector<25x384xf32>
    %c0_53 = arith.constant 0 : index
    %c0_54 = arith.constant 0 : index
    %46 = vector.load %arg6[%c0_53, %c0_54] : memref<25x1xf32, #tpu.memory_space<vmem>>, vector<25x1xf32>
    %47 = vector.broadcast %46 : vector<25x1xf32> to vector<25x384xf32>
    %48 = arith.addf %45, %47 : vector<25x384xf32>
    %c0_55 = arith.constant 0 : index
    %c128_56 = arith.constant 128 : index
    %49 = vector.load %arg10[%c0_55, %c128_56] : memref<25x640xf32, #tpu.memory_space<vmem>>, vector<25x384xf32>
    tpu.vector_store %arg10[%c0_55, %c128_56], %48 {strides = array<i32>} : memref<25x640xf32, #tpu.memory_space<vmem>>, vector<25x384xf32>,
    %c0_57 = arith.constant 0 : index
    %c166 = arith.constant 166 : index
    %50 = vector.load %arg10[%c0_57, %c166] : memref<25x640xf32, #tpu.memory_space<vmem>>, vector<25x384xf32>
    %cst_58 = arith.constant 0.000000e+00 : f32
    %51 = vector.broadcast %cst_58 : f32 to vector<1x384xf32>
    %c0_59 = arith.constant 0 : index
    %c0_60 = arith.constant 0 : index
    %c128_61 = arith.constant 128 : index
    %52 = vector.load %arg1[%c0_59, %c0_60, %c128_61] : memref<1x1x640xf32, #tpu.memory_space<vmem>>, vector<1x1x384xf32>
    %53 = vector.shape_cast %52 : vector<1x1x384xf32> to vector<1x384xf32>
    %54 = vector.extract_strided_slice %50 {offsets = [0, 0], sizes = [1, 384], strides = [1, 1]} : vector<25x384xf32> to vector<1x384xf32>
    %55 = arith.mulf %53, %54 : vector<1x384xf32>
    %56 = arith.addf %51, %55 : vector<1x384xf32>
    %c0_62 = arith.constant 0 : index
    %c0_63 = arith.constant 0 : index
    %c129_64 = arith.constant 129 : index
    %57 = vector.load %arg1[%c0_62, %c0_63, %c129_64] : memref<1x1x640xf32, #tpu.memory_space<vmem>>, vector<1x1x384xf32>
    %58 = vector.shape_cast %57 : vector<1x1x384xf32> to vector<1x384xf32>
    %59 = vector.extract_strided_slice %50 {offsets = [1, 0], sizes = [1, 384], strides = [1, 1]} : vector<25x384xf32> to vector<1x384xf32>
    %60 = arith.mulf %58, %59 : vector<1x384xf32>
    %61 = arith.addf %56, %60 : vector<1x384xf32>
    %c0_65 = arith.constant 0 : index
    %c0_66 = arith.constant 0 : index
    %c130 = arith.constant 130 : index
    %62 = vector.load %arg1[%c0_65, %c0_66, %c130] : memref<1x1x640xf32, #tpu.memory_space<vmem>>, vector<1x1x384xf32>
    %63 = vector.shape_cast %62 : vector<1x1x384xf32> to vector<1x384xf32>
    %64 = vector.extract_strided_slice %50 {offsets = [2, 0], sizes = [1, 384], strides = [1, 1]} : vector<25x384xf32> to vector<1x384xf32>
    %65 = arith.mulf %63, %64 : vector<1x384xf32>
    %66 = arith.addf %61, %65 : vector<1x384xf32>
    %c0_67 = arith.constant 0 : index
    %c0_68 = arith.constant 0 : index
    %c131 = arith.constant 131 : index
    %67 = vector.load %arg1[%c0_67, %c0_68, %c131] : memref<1x1x640xf32, #tpu.memory_space<vmem>>, vector<1x1x384xf32>
    %68 = vector.shape_cast %67 : vector<1x1x384xf32> to vector<1x384xf32>
    %69 = vector.extract_strided_slice %50 {offsets = [3, 0], sizes = [1, 384], strides = [1, 1]} : vector<25x384xf32> to vector<1x384xf32>
    %70 = arith.mulf %68, %69 : vector<1x384xf32>
    %71 = arith.addf %66, %70 : vector<1x384xf32>
    %c0_69 = arith.constant 0 : index
    %c0_70 = arith.constant 0 : index
    %c132 = arith.constant 132 : index
    %72 = vector.load %arg1[%c0_69, %c0_70, %c132] : memref<1x1x640xf32, #tpu.memory_space<vmem>>, vector<1x1x384xf32>
    %73 = vector.shape_cast %72 : vector<1x1x384xf32> to vector<1x384xf32>
    %74 = vector.extract_strided_slice %50 {offsets = [4, 0], sizes = [1, 384], strides = [1, 1]} : vector<25x384xf32> to vector<1x384xf32>
    %75 = arith.mulf %73, %74 : vector<1x384xf32>
    %76 = arith.addf %71, %75 : vector<1x384xf32>
    %c0_71 = arith.constant 0 : index
    %c0_72 = arith.constant 0 : index
    %c146_73 = arith.constant 146 : index
    %77 = vector.load %arg1[%c0_71, %c0_72, %c146_73] : memref<1x1x640xf32, #tpu.memory_space<vmem>>, vector<1x1x384xf32>
    %78 = vector.shape_cast %77 : vector<1x1x384xf32> to vector<1x384xf32>
    %79 = vector.extract_strided_slice %50 {offsets = [5, 0], sizes = [1, 384], strides = [1, 1]} : vector<25x384xf32> to vector<1x384xf32>
    %80 = arith.mulf %78, %79 : vector<1x384xf32>
    %81 = arith.addf %76, %80 : vector<1x384xf32>
    %c0_74 = arith.constant 0 : index
    %c0_75 = arith.constant 0 : index
    %c147_76 = arith.constant 147 : index
    %82 = vector.load %arg1[%c0_74, %c0_75, %c147_76] : memref<1x1x640xf32, #tpu.memory_space<vmem>>, vector<1x1x384xf32>
    %83 = vector.shape_cast %82 : vector<1x1x384xf32> to vector<1x384xf32>
    %84 = vector.extract_strided_slice %50 {offsets = [6, 0], sizes = [1, 384], strides = [1, 1]} : vector<25x384xf32> to vector<1x384xf32>
    %85 = arith.mulf %83, %84 : vector<1x384xf32>
    %86 = arith.addf %81, %85 : vector<1x384xf32>
    %c0_77 = arith.constant 0 : index
    %c0_78 = arith.constant 0 : index
    %c148 = arith.constant 148 : index
    %87 = vector.load %arg1[%c0_77, %c0_78, %c148] : memref<1x1x640xf32, #tpu.memory_space<vmem>>, vector<1x1x384xf32>
    %88 = vector.shape_cast %87 : vector<1x1x384xf32> to vector<1x384xf32>
    %89 = vector.extract_strided_slice %50 {offsets = [7, 0], sizes = [1, 384], strides = [1, 1]} : vector<25x384xf32> to vector<1x384xf32>
    %90 = arith.mulf %88, %89 : vector<1x384xf32>
    %91 = arith.addf %86, %90 : vector<1x384xf32>
    %c0_79 = arith.constant 0 : index
    %c0_80 = arith.constant 0 : index
    %c149 = arith.constant 149 : index
    %92 = vector.load %arg1[%c0_79, %c0_80, %c149] : memref<1x1x640xf32, #tpu.memory_space<vmem>>, vector<1x1x384xf32>
    %93 = vector.shape_cast %92 : vector<1x1x384xf32> to vector<1x384xf32>
    %94 = vector.extract_strided_slice %50 {offsets = [8, 0], sizes = [1, 384], strides = [1, 1]} : vector<25x384xf32> to vector<1x384xf32>
    %95 = arith.mulf %93, %94 : vector<1x384xf32>
    %96 = arith.addf %91, %95 : vector<1x384xf32>
    %c0_81 = arith.constant 0 : index
    %c0_82 = arith.constant 0 : index
    %c150 = arith.constant 150 : index
    %97 = vector.load %arg1[%c0_81, %c0_82, %c150] : memref<1x1x640xf32, #tpu.memory_space<vmem>>, vector<1x1x384xf32>
    %98 = vector.shape_cast %97 : vector<1x1x384xf32> to vector<1x384xf32>
    %99 = vector.extract_strided_slice %50 {offsets = [9, 0], sizes = [1, 384], strides = [1, 1]} : vector<25x384xf32> to vector<1x384xf32>
    %100 = arith.mulf %98, %99 : vector<1x384xf32>
    %101 = arith.addf %96, %100 : vector<1x384xf32>
    %c0_83 = arith.constant 0 : index
    %c0_84 = arith.constant 0 : index
    %c164 = arith.constant 164 : index
    %102 = vector.load %arg1[%c0_83, %c0_84, %c164] : memref<1x1x640xf32, #tpu.memory_space<vmem>>, vector<1x1x384xf32>
    %103 = vector.shape_cast %102 : vector<1x1x384xf32> to vector<1x384xf32>
    %104 = vector.extract_strided_slice %50 {offsets = [10, 0], sizes = [1, 384], strides = [1, 1]} : vector<25x384xf32> to vector<1x384xf32>
    %105 = arith.mulf %103, %104 : vector<1x384xf32>
    %106 = arith.addf %101, %105 : vector<1x384xf32>
    %c0_85 = arith.constant 0 : index
    %c0_86 = arith.constant 0 : index
    %c165 = arith.constant 165 : index
    %107 = vector.load %arg1[%c0_85, %c0_86, %c165] : memref<1x1x640xf32, #tpu.memory_space<vmem>>, vector<1x1x384xf32>
    %108 = vector.shape_cast %107 : vector<1x1x384xf32> to vector<1x384xf32>
    %109 = vector.extract_strided_slice %50 {offsets = [11, 0], sizes = [1, 384], strides = [1, 1]} : vector<25x384xf32> to vector<1x384xf32>
    %110 = arith.mulf %108, %109 : vector<1x384xf32>
    %111 = arith.addf %106, %110 : vector<1x384xf32>
    %c0_87 = arith.constant 0 : index
    %c0_88 = arith.constant 0 : index
    %c166_89 = arith.constant 166 : index
    %112 = vector.load %arg1[%c0_87, %c0_88, %c166_89] : memref<1x1x640xf32, #tpu.memory_space<vmem>>, vector<1x1x384xf32>
    %113 = vector.shape_cast %112 : vector<1x1x384xf32> to vector<1x384xf32>
    %114 = vector.extract_strided_slice %50 {offsets = [12, 0], sizes = [1, 384], strides = [1, 1]} : vector<25x384xf32> to vector<1x384xf32>
    %115 = arith.mulf %113, %114 : vector<1x384xf32>
    %116 = arith.addf %111, %115 : vector<1x384xf32>
    %c0_90 = arith.constant 0 : index
    %c0_91 = arith.constant 0 : index
    %c167 = arith.constant 167 : index
    %117 = vector.load %arg1[%c0_90, %c0_91, %c167] : memref<1x1x640xf32, #tpu.memory_space<vmem>>, vector<1x1x384xf32>
    %118 = vector.shape_cast %117 : vector<1x1x384xf32> to vector<1x384xf32>
    %119 = vector.extract_strided_slice %50 {offsets = [13, 0], sizes = [1, 384], strides = [1, 1]} : vector<25x384xf32> to vector<1x384xf32>
    %120 = arith.mulf %118, %119 : vector<1x384xf32>
    %121 = arith.addf %116, %120 : vector<1x384xf32>
    %c0_92 = arith.constant 0 : index
    %c0_93 = arith.constant 0 : index
    %c168 = arith.constant 168 : index
    %122 = vector.load %arg1[%c0_92, %c0_93, %c168] : memref<1x1x640xf32, #tpu.memory_space<vmem>>, vector<1x1x384xf32>
    %123 = vector.shape_cast %122 : vector<1x1x384xf32> to vector<1x384xf32>
    %124 = vector.extract_strided_slice %50 {offsets = [14, 0], sizes = [1, 384], strides = [1, 1]} : vector<25x384xf32> to vector<1x384xf32>
    %125 = arith.mulf %123, %124 : vector<1x384xf32>
    %126 = arith.addf %121, %125 : vector<1x384xf32>
    %c0_94 = arith.constant 0 : index
    %c0_95 = arith.constant 0 : index
    %c182 = arith.constant 182 : index
    %127 = vector.load %arg1[%c0_94, %c0_95, %c182] : memref<1x1x640xf32, #tpu.memory_space<vmem>>, vector<1x1x384xf32>
    %128 = vector.shape_cast %127 : vector<1x1x384xf32> to vector<1x384xf32>
    %129 = vector.extract_strided_slice %50 {offsets = [15, 0], sizes = [1, 384], strides = [1, 1]} : vector<25x384xf32> to vector<1x384xf32>
    %130 = arith.mulf %128, %129 : vector<1x384xf32>
    %131 = arith.addf %126, %130 : vector<1x384xf32>
    %c0_96 = arith.constant 0 : index
    %c0_97 = arith.constant 0 : index
    %c183 = arith.constant 183 : index
    %132 = vector.load %arg1[%c0_96, %c0_97, %c183] : memref<1x1x640xf32, #tpu.memory_space<vmem>>, vector<1x1x384xf32>
    %133 = vector.shape_cast %132 : vector<1x1x384xf32> to vector<1x384xf32>
    %134 = vector.extract_strided_slice %50 {offsets = [16, 0], sizes = [1, 384], strides = [1, 1]} : vector<25x384xf32> to vector<1x384xf32>
    %135 = arith.mulf %133, %134 : vector<1x384xf32>
    %136 = arith.addf %131, %135 : vector<1x384xf32>
    %c0_98 = arith.constant 0 : index
    %c0_99 = arith.constant 0 : index
    %c184 = arith.constant 184 : index
    %137 = vector.load %arg1[%c0_98, %c0_99, %c184] : memref<1x1x640xf32, #tpu.memory_space<vmem>>, vector<1x1x384xf32>
    %138 = vector.shape_cast %137 : vector<1x1x384xf32> to vector<1x384xf32>
    %139 = vector.extract_strided_slice %50 {offsets = [17, 0], sizes = [1, 384], strides = [1, 1]} : vector<25x384xf32> to vector<1x384xf32>
    %140 = arith.mulf %138, %139 : vector<1x384xf32>
    %141 = arith.addf %136, %140 : vector<1x384xf32>
    %c0_100 = arith.constant 0 : index
    %c0_101 = arith.constant 0 : index
    %c185 = arith.constant 185 : index
    %142 = vector.load %arg1[%c0_100, %c0_101, %c185] : memref<1x1x640xf32, #tpu.memory_space<vmem>>, vector<1x1x384xf32>
    %143 = vector.shape_cast %142 : vector<1x1x384xf32> to vector<1x384xf32>
    %144 = vector.extract_strided_slice %50 {offsets = [18, 0], sizes = [1, 384], strides = [1, 1]} : vector<25x384xf32> to vector<1x384xf32>
    %145 = arith.mulf %143, %144 : vector<1x384xf32>
    %146 = arith.addf %141, %145 : vector<1x384xf32>
    %c0_102 = arith.constant 0 : index
    %c0_103 = arith.constant 0 : index
    %c186 = arith.constant 186 : index
    %147 = vector.load %arg1[%c0_102, %c0_103, %c186] : memref<1x1x640xf32, #tpu.memory_space<vmem>>, vector<1x1x384xf32>
    %148 = vector.shape_cast %147 : vector<1x1x384xf32> to vector<1x384xf32>
    %149 = vector.extract_strided_slice %50 {offsets = [19, 0], sizes = [1, 384], strides = [1, 1]} : vector<25x384xf32> to vector<1x384xf32>
    %150 = arith.mulf %148, %149 : vector<1x384xf32>
    %151 = arith.addf %146, %150 : vector<1x384xf32>
    %c0_104 = arith.constant 0 : index
    %c0_105 = arith.constant 0 : index
    %c200 = arith.constant 200 : index
    %152 = vector.load %arg1[%c0_104, %c0_105, %c200] : memref<1x1x640xf32, #tpu.memory_space<vmem>>, vector<1x1x384xf32>
    %153 = vector.shape_cast %152 : vector<1x1x384xf32> to vector<1x384xf32>
    %154 = vector.extract_strided_slice %50 {offsets = [20, 0], sizes = [1, 384], strides = [1, 1]} : vector<25x384xf32> to vector<1x384xf32>
    %155 = arith.mulf %153, %154 : vector<1x384xf32>
    %156 = arith.addf %151, %155 : vector<1x384xf32>
    %c0_106 = arith.constant 0 : index
    %c0_107 = arith.constant 0 : index
    %c201 = arith.constant 201 : index
    %157 = vector.load %arg1[%c0_106, %c0_107, %c201] : memref<1x1x640xf32, #tpu.memory_space<vmem>>, vector<1x1x384xf32>
    %158 = vector.shape_cast %157 : vector<1x1x384xf32> to vector<1x384xf32>
    %159 = vector.extract_strided_slice %50 {offsets = [21, 0], sizes = [1, 384], strides = [1, 1]} : vector<25x384xf32> to vector<1x384xf32>
    %160 = arith.mulf %158, %159 : vector<1x384xf32>
    %161 = arith.addf %156, %160 : vector<1x384xf32>
    %c0_108 = arith.constant 0 : index
    %c0_109 = arith.constant 0 : index
    %c202 = arith.constant 202 : index
    %162 = vector.load %arg1[%c0_108, %c0_109, %c202] : memref<1x1x640xf32, #tpu.memory_space<vmem>>, vector<1x1x384xf32>
    %163 = vector.shape_cast %162 : vector<1x1x384xf32> to vector<1x384xf32>
    %164 = vector.extract_strided_slice %50 {offsets = [22, 0], sizes = [1, 384], strides = [1, 1]} : vector<25x384xf32> to vector<1x384xf32>
    %165 = arith.mulf %163, %164 : vector<1x384xf32>
    %166 = arith.addf %161, %165 : vector<1x384xf32>
    %c0_110 = arith.constant 0 : index
    %c0_111 = arith.constant 0 : index
    %c203 = arith.constant 203 : index
    %167 = vector.load %arg1[%c0_110, %c0_111, %c203] : memref<1x1x640xf32, #tpu.memory_space<vmem>>, vector<1x1x384xf32>
    %168 = vector.shape_cast %167 : vector<1x1x384xf32> to vector<1x384xf32>
    %169 = vector.extract_strided_slice %50 {offsets = [23, 0], sizes = [1, 384], strides = [1, 1]} : vector<25x384xf32> to vector<1x384xf32>
    %170 = arith.mulf %168, %169 : vector<1x384xf32>
    %171 = arith.addf %166, %170 : vector<1x384xf32>
    %c0_112 = arith.constant 0 : index
    %c0_113 = arith.constant 0 : index
    %c204 = arith.constant 204 : index
    %172 = vector.load %arg1[%c0_112, %c0_113, %c204] : memref<1x1x640xf32, #tpu.memory_space<vmem>>, vector<1x1x384xf32>
    %173 = vector.shape_cast %172 : vector<1x1x384xf32> to vector<1x384xf32>
    %174 = vector.extract_strided_slice %50 {offsets = [24, 0], sizes = [1, 384], strides = [1, 1]} : vector<25x384xf32> to vector<1x384xf32>
    %175 = arith.mulf %173, %174 : vector<1x384xf32>
    %176 = arith.addf %171, %175 : vector<1x384xf32>
    %c0_114 = arith.constant 0 : index
    %c0_115 = arith.constant 0 : index
    %c0_116 = arith.constant 0 : index
    %177 = vector.load %arg7[%c0_114, %c0_115, %c0_116] : memref<1x1x384xf32, #tpu.memory_space<vmem>>, vector<1x1x384xf32>
    %178 = vector.shape_cast %177 : vector<1x1x384xf32> to vector<1x384xf32>
    %179 = vector.shape_cast %176 : vector<1x384xf32> to vector<1x1x384xf32>
    tpu.vector_store %arg7[%c0_114, %c0_115, %c0_116], %179 {strides = array<i32>} : memref<1x1x384xf32, #tpu.memory_space<vmem>>, vector<1x1x384xf32>,
    return
  }
  func.func @transform_0(%arg0: i32) -> (i32, i32, i32) {
    %c0_i32 = arith.constant 0 : i32
    %c0_i32_0 = arith.constant 0 : i32
    %c0_i32_1 = arith.constant 0 : i32
    return %arg0, %c0_i32, %c0_i32_0 : i32, i32, i32
  }
  func.func @transform_1(%arg0: i32) -> (i32, i32) {
    %c0_i32 = arith.constant 0 : i32
    %c0_i32_0 = arith.constant 0 : i32
    %c0_i32_1 = arith.constant 0 : i32
    return %c0_i32, %c0_i32_0 : i32, i32
  }
  func.func @transform_2(%arg0: i32) -> (i32, i32) {
    %c0_i32 = arith.constant 0 : i32
    %c0_i32_0 = arith.constant 0 : i32
    %c0_i32_1 = arith.constant 0 : i32
    return %c0_i32, %c0_i32_0 : i32, i32
  }
  func.func @transform_3(%arg0: i32) -> (i32, i32) {
    %c0_i32 = arith.constant 0 : i32
    %c0_i32_0 = arith.constant 0 : i32
    %c0_i32_1 = arith.constant 0 : i32
    return %c0_i32, %c0_i32_0 : i32, i32
  }
  func.func @transform_4(%arg0: i32) -> (i32, i32) {
    %c0_i32 = arith.constant 0 : i32
    %c0_i32_0 = arith.constant 0 : i32
    %c0_i32_1 = arith.constant 0 : i32
    return %c0_i32, %c0_i32_0 : i32, i32
  }
  func.func @transform_5(%arg0: i32) -> (i32, i32) {
    %c0_i32 = arith.constant 0 : i32
    %c0_i32_0 = arith.constant 0 : i32
    %c0_i32_1 = arith.constant 0 : i32
    return %c0_i32, %c0_i32_0 : i32, i32
  }
  func.func @transform_6(%arg0: i32) -> (i32, i32, i32) {
    %c0_i32 = arith.constant 0 : i32
    %c0_i32_0 = arith.constant 0 : i32
    %c0_i32_1 = arith.constant 0 : i32
    return %arg0, %c0_i32, %c0_i32_0 : i32, i32, i32
  }
}

</mosaic_0001>

<bundles_post_ra>
// kernel: tpu_custom_call.1
= control target key start
LH: loop header
LB: loop body
LE: loop exit
PB: predicated region body
PF: predicated region fallthrough
CT: control target
= control target key end

     0   :  { %11 = vsyncpa [#allocation6], 0  ;;  %s2849_s0 = inlined_call_operand.vmem [shape: f32[2,1,640], index: 0, kind: input, shape index: {}]   ;;  %s2850_s1 = inlined_call_operand.vmem [shape: f32[1,384], index: 1, kind: input, shape index: {}]   ;;  %s2851_s2 = inlined_call_operand.hbm [shape: f32[8,9], index: 2, kind: input, shape index: {}]   ;;  %s2852_s3 = inlined_call_operand.vmem [shape: f32[8,1], index: 3, kind: input, shape index: {}]   ;;  %s2853_s4 = inlined_call_operand.vmem [shape: f32[25,72], index: 4, kind: input, shape index: {}]   ;;  %s2854_s5 = inlined_call_operand.vmem [shape: f32[25,1], index: 5, kind: input, shape index: {}]   ;;  %s2855_s6 = inlined_call_operand.hbm [shape: f32[2,1,384], index: 6, kind: output, shape index: {}]  }
   0x1   :  { %12 = vsyncpa [#allocation7], 0 }
   0x2   :  { %14 = vsyncpa [#allocation7 + $0x1], 0  ;;  %s2204_s21 = smov 0   ;;  %s2206_s22 = smov 0  }
   0x3   :  { %s2208_s23 = smov 0   ;;  %s2210_s24 = smov 0  }
   0x4 LB: > { %s2225_s25 = sadd.s32 4294967295, %s2121_s24   ;;  %s1861_s26 = sadd.s32 4294967294, %s2121_s24   ;;  %s2121_s24 = sphi %s2210_s24, %s2872_s24   ;;  %s2117_s23 = sphi %s2208_s23, %s2871_s23   ;;  %s2113_s22 = sphi %s2206_s22, %s2870_s22   ;;  %s2109_s21 = sphi %s2204_s21, %s2869_s21  }
   0x5   : > { %s2229_s27 = sadd.s32 1, %s2121_s24   ;;  %s158_s28 = sadd.s32 1, %s2117_s23 }
   0x6   : > { %s155_s29 = ssub.s32 %s2121_s24, %s2229_s27  ;;  %p168_p0 = scmp.ne.s32.totalorder %s2117_s23, %s2113_s22 }
   0x7   : > { %p156_p1 = scmp.eq.s32.totalorder %s155_s29, 0  ;;  %p169_p2 = scmp.eq.s32.totalorder %s2225_s25, 1 }
   0x8   : > { %p174_p3 = scmp.ne.s32.totalorder %s2113_s22, %s2109_s21  ;;  %p175_p4 = scmp.eq.s32.totalorder %s1861_s26, 1 }
   0x9   : > { %s2240_s30 = scalar_select %p156_p1, %s2117_s23, %s158_s28  }
   0xa   : > { %p2242_p5 = por %p169_p2, %p168_p0  ;;  %p2246_p6 = por %p175_p4, %p174_p3 }
   0xb   : > { %p1862_p7 = scmp.ge.s32.totalorder %s2121_s24, 1  ;;  %p182_p8 = scmp.lt.s32.totalorder %s2121_s24, 3 }
   0xc   : > { %s2863_s8 = scalar_select %p2246_p6, 1, 0 }
   0xd   : > { %p1947_p9 = scmp.eq.s32.totalorder %s2225_s25, 0  ;;  %p2253_p10 = pnand %p1862_p7, %p182_p8 }
   0xe   : > { %s2123_s10 = smov [#allocation5]  }
   0xf   : > { %s198_s11 = sshll.u32 %s2123_s10, 4  ;;  %p1939_p11 = pneg %p2253_p10  ;;  %s199_s11 = int_to_ptr.vmem [resolvable:$true] %s198_s11 }
  0x10   : > { %s2042_s12 = scalar_lea.vmem %s199_s11, 128  ;;  %p2050_p3 = scmp.lt.s32.totalorder %s199_s11, %s199_s11 }
  0x11   : > { %p1940_p12 = pnand %p1947_p9, %p1939_p11  ;;  %p2043_p0 = scmp.ne.s32.totalorder %s199_s11, %s2042_s12 }
  0x12   : > { %p2051_p4 = scmp.lt.s32.totalorder %s2042_s12, %s2042_s12 }
  0x13   : > { %p2033_p13 = pneg %p1940_p12 }
  0x14   : > { %p2052_p6 = por %p2051_p4, %p2050_p3 }
  0x15   : > { %p2045_p1 = pnand %p2043_p0, %p2033_p13 }
  0x17   : > { %p2046_p2 = pneg %p2045_p1 }
  0x19   : > { %p2053_p7 = pnand %p2052_p6, %p2046_p2 }
  0x1b   : > { %2056 = shalt.err (!%p2053_p7)
}
  0x1c   : > { %1942 = dma.hbm_to_vmem [thread:$0]  (!%p1940_p12), %s2851_s2, 128, %s199_s11, [#allocation6]  }
  0x1d   : > { %227 = sbr.rel (%p2253_p10) target bundleno = 1352 (0x548), region = 44 }
  0x22   : > { %2100 = dma.done.wait (%p1947_p9), [#allocation6], 128  }
  0x23   : > { %2102 = vsyncadd (%p1947_p9), [#allocation6], 4294967168  ;;  %p256_p8 = scmp.lt.s32.totalorder %s2225_s25, 1  ;;  %v290_v0 = vlaneseq  ;;  %v2124_v1 = vmov 0.0   ;;  %s2858_s20 = smov 127   ;;  %vm318_vm0 = vcmask 1039360  }
  0x24   : > { %266 = vst [vmem:[#allocation4] sm:$0xff] %v2124_v1  ;;  %282 = vst [vmem:[#allocation4 + $0x20] sm:$0x1] %v2124_v1  ;;  %607 = vmatprep.mubr.f32.mxu1 %v2124_v1  ;;  %1041 = vmatprep.mubr.f32.mxu0 %v2124_v1  ;;  %s2860_s26 = smov 126   ;;  %s2127_s28 = smov 110   ;;  %vm334_vm1 = vcmask 1031168  }
  0x25   : > { %283 = vst [vmem:[#allocation4 + $0x48] sm:$0x1] %v2124_v1  ;;  %284 = vst [vmem:[#allocation4 + $0x70] sm:$0x1] %v2124_v1  ;;  %s257_s15 = scalar_select %p256_p8, %s2225_s25, 1  ;;  %v2280_v2 = vshrl.u32 %v290_v0, 7 }
  0x26   : > { %285 = vst [vmem:[#allocation4 + $0x90] sm:$0x1] %v2124_v1  ;;  %s2128_s29 = smov 109   ;;  %s2129_s9 = smov 108   ;;  %vm461_vm2 = vcmask 1040384   ;;  %vm466_vm3 = vcmask 1041408  }
  0x27   : > { %s1931_s16 = smul.u32 5, %s257_s15  ;;  %v304_v3 = vsub.s32 3, %v2280_v2  ;;  %v2284_v4 = vsub.s32 1, %v2280_v2  ;;  %v2292_v5 = vsub.s32 2, %v2280_v2  ;;  %v2295_v6 = vsub.s32 0, %v2280_v2  ;;  %s2130_s10 = smov 92  }
  0x28   : > { %s2856_s11 = smov 90   ;;  %s2132_s12 = smov 91   ;;  %vm350_vm4 = vcmask 900096   ;;  %vm471_vm5 = vcmask 1042432   ;;  %vm476_vm6 = vcmask 1043456   ;;  %vm377_vm7 = vcmask 891904  }
  0x29   : > { %s2289_s19 = scalar_lea.vmem %s2849_s0, %s1931_s16  ;;  %s2133_s13 = smov 19   ;;  %vm481_vm8 = vcmask 1044480   ;;  %vm409_vm9 = vcmask 883712   ;;  %vm486_vm10 = vcmask 1045504   ;;  %vm457_vm11 = vcmask 736256  }
  0x2a   : > { %v286_v7 = vld [vmem:[%s2289_s19] sm:$0xf]  ;;  %vm425_vm12 = vcmask 752640   ;;  %vm441_vm13 = vcmask 744448   ;;  %vm491_vm14 = vcmask 1046528   ;;  %vm523_vm15 = vcmask 154624  }
  0x2b   : > { %v2298_v8 = vrot.slane %v286_v7, %v304_v3  ;;  %v2301_v9 = vrot.slane %v286_v7, %v2284_v4  ;;  %v2308_v10 = vrot.slane %v286_v7, %v2292_v5  ;;  %v2311_v11 = vrot.slane %v286_v7, %v2295_v6  ;;  %v287_v12 = vld [vmem:[%s2289_s19 + $0x1] sm:$0x7]  ;;  %s2137_s18 = smov 93   ;;  %s2138_s14 = smov 94  }
  0x2c   : > { %v362_v13 = vrot.slane %v287_v12, %v2295_v6  ;;  %v366_v14 = vrot.slane %v287_v12, %v2284_v4  ;;  %v288_v15 = vld [vmem:[%s2289_s19 + $0x1] sm:$0xf]  ;;  %v370_v16 = vrot.slane %v287_v12, %v2292_v5  ;;  %s2866_s15 = smov 127   ;;  %s2141_s16 = smov 1  }
  0x2d   : > { %316 = vrot.lane.b32.xlu1 %v2298_v8, %s2858_s20  ;;  %312 = vrot.lane.b32.xlu0 %v2301_v9, %s2858_s20  ;;  %v388_v17 = vrot.slane %v288_v15, %v2295_v6  ;;  %v392_v18 = vrot.slane %v288_v15, %v2284_v4  ;;  %v396_v19 = vrot.slane %v288_v15, %v2292_v5  ;;  %s2142_s17 = smov 2  }
  0x2e   : > { %v400_v20 = vrot.slane %v288_v15, %v304_v3 }
  0x31   : > { %314 = vrot.lane.b32.xlu0 %v2308_v10, %s2858_s20  ;;  %310 = vrot.lane.b32.xlu1 %v2311_v11, %s2858_s20 }
  0x35   : > { %328 = vrot.lane.b32.xlu0 %v2301_v9, %s2860_s26  ;;  %330 = vrot.lane.b32.xlu1 %v2308_v10, %s2860_s26 }
  0x39   : > { %332 = vrot.lane.b32.xlu0 %v2298_v8, %s2860_s26  ;;  %326 = vrot.lane.b32.xlu1 %v2311_v11, %s2860_s26 }
  0x3d   : > { %344 = vrot.lane.b32.xlu0 %v2301_v9, %s2127_s28  ;;  %346 = vrot.lane.b32.xlu1 %v2308_v10, %s2127_s28 }
  0x41   : > { %348 = vrot.lane.b32.xlu0 %v2298_v8, %s2127_s28  ;;  %342 = vrot.lane.b32.xlu1 %v2311_v11, %s2127_s28 }
  0x45   : > { %371 = vrot.lane.b32.xlu0 %v362_v13, %s2128_s29  ;;  %373 = vrot.lane.b32.xlu1 %v366_v14, %s2128_s29 }
  0x49   : > { %375 = vrot.lane.b32.xlu0 %v370_v16, %s2128_s29  ;;  %401 = vrot.lane.b32.xlu1 %v388_v17, %s2129_s9 }
  0x4d   : > { %403 = vrot.lane.b32.xlu0 %v392_v18, %s2129_s9  ;;  %405 = vrot.lane.b32.xlu1 %v396_v19, %s2129_s9 }
  0x51   : > { %417 = vrot.lane.b32.xlu0 %v388_v17, %s2130_s10  ;;  %419 = vrot.lane.b32.xlu1 %v392_v18, %s2130_s10 }
  0x55   : > { %421 = vrot.lane.b32.xlu0 %v396_v19, %s2130_s10  ;;  %449 = vrot.lane.b32.xlu1 %v388_v17, %s2856_s11 }
  0x59   : > { %451 = vrot.lane.b32.xlu0 %v392_v18, %s2856_s11  ;;  %453 = vrot.lane.b32.xlu1 %v396_v19, %s2856_s11 }
  0x5d   : > { %433 = vrot.lane.b32.xlu0 %v388_v17, %s2132_s12  ;;  %435 = vrot.lane.b32.xlu1 %v392_v18, %s2132_s12 }
  0x61   : > { %437 = vrot.lane.b32.xlu0 %v396_v19, %s2132_s12  ;;  %407 = vrot.lane.b32.xlu1 %v400_v20, %s2129_s9 }
  0x65   : > { %423 = vrot.lane.b32.xlu0 %v400_v20, %s2130_s10  ;;  %455 = vrot.lane.b32.xlu1 %v400_v20, %s2856_s11 }
  0x69   : > { %439 = vrot.lane.b32.xlu0 %v400_v20, %s2132_s12 }
  0x9f   : > { %v2360_v21 = vpop.permute.xlu1 %316  ;;  %v313_v22 = vpop.permute.xlu0 %312 }
  0xa3   : > { %v315_v23 = vpop.permute.xlu0 %314  ;;  %v311_v24 = vpop.permute.xlu1 %310 }
  0xa4   : > { %v320_v41 = vsel %vm318_vm0, %v313_v22, %v315_v23  ;;  %v321_v47 = vsel %vm318_vm0, %v315_v23, %v2360_v21  ;;  %v319_v48 = vsel %vm318_vm0, %v311_v24, %v313_v22 }
  0xa5   : > { %v463_v45 = vsel %vm461_vm2, %v2301_v9, %v320_v41  ;;  %v464_v60 = vsel %vm461_vm2, %v2308_v10, %v321_v47  ;;  %v462_v3 = vsel %vm461_vm2, %v2311_v11, %v319_v48 }
  0xa7   : > { %v329_v25 = vpop.permute.xlu0 %328  ;;  %v331_v26 = vpop.permute.xlu1 %330 }
  0xa8   : > { %v336_v44 = vsel %vm334_vm1, %v329_v25, %v331_v26 }
  0xa9   : > { %v468_v49 = vsel %vm466_vm3, %v463_v45, %v336_v44 }
  0xab   : > { %v2362_v27 = vpop.permute.xlu0 %332  ;;  %v327_v28 = vpop.permute.xlu1 %326 }
  0xac   : > { %v337_v53 = vsel %vm334_vm1, %v331_v26, %v2362_v27  ;;  %v335_v57 = vsel %vm334_vm1, %v327_v28, %v329_v25 }
  0xad   : > { %v469_v7 = vsel %vm466_vm3, %v464_v60, %v337_v53  ;;  %v467_v10 = vsel %vm466_vm3, %v462_v3, %v335_v57  ;;  %v496_v57 = vld [vmem:[#allocation5] sm:$0xff] }
  0xaf   : > { %v345_v29 = vpop.permute.xlu0 %344  ;;  %v347_v30 = vpop.permute.xlu1 %346 }
  0xb0   : > { %v352_v46 = vsel %vm350_vm4, %v345_v29, %v347_v30 }
  0xb1   : > { %v473_v58 = vsel %vm471_vm5, %v468_v49, %v352_v46 }
  0xb3   : > { %v2364_v31 = vpop.permute.xlu0 %348  ;;  %v343_v32 = vpop.permute.xlu1 %342 }
  0xb4   : > { %v353_v61 = vsel %vm350_vm4, %v347_v30, %v2364_v31  ;;  %v351_v62 = vsel %vm350_vm4, %v343_v32, %v345_v29 }
  0xb5   : > { %v474_v11 = vsel %vm471_vm5, %v469_v7, %v353_v61  ;;  %v472_v18 = vsel %vm471_vm5, %v467_v10, %v351_v62 }
  0xb7   : > { %v2366_v33 = vpop.permute.xlu0 %371  ;;  %v374_v34 = vpop.permute.xlu1 %373 }
  0xb8   : > { %v378_v50 = vsel %vm377_vm7, %v2366_v33, %v374_v34  ;;  %v477_v22 = vsel %vm476_vm6, %v472_v18, %v2366_v33 }
  0xb9   : > { %v478_v63 = vsel %vm476_vm6, %v473_v58, %v378_v50 }
  0xbb   : > { %v2368_v35 = vpop.permute.xlu0 %375  ;;  %v2370_v36 = vpop.permute.xlu1 %401 }
  0xbc   : > { %v379_v9 = vsel %vm377_vm7, %v374_v34, %v2368_v35  ;;  %v482_v24 = vsel %vm481_vm8, %v477_v22, %v2370_v36  ;;  %v2134_v34 = vmov 0  }
  0xbd   : > { %v479_v23 = vsel %vm476_vm6, %v474_v11, %v379_v9  ;;  %2027 = vset.pattern.permute.xlu1 %v2134_v34  ;;  %2028 = vset.pattern.permute.xlu0 %v2134_v34 }
  0xbf   : > { %v404_v37 = vpop.permute.xlu0 %403  ;;  %v2372_v38 = vpop.permute.xlu1 %405 }
  0xc0   : > { %v410_v54 = vsel %vm409_vm9, %v2370_v36, %v404_v37  ;;  %v411_v15 = vsel %vm409_vm9, %v404_v37, %v2372_v38  ;;  %v465_v36 = vsel %vm461_vm2, %v2298_v8, %v2360_v21 }
  0xc1   : > { %v483_v12 = vsel %vm481_vm8, %v478_v63, %v410_v54  ;;  %v484_v25 = vsel %vm481_vm8, %v479_v23, %v411_v15  ;;  %v470_v41 = vsel %vm466_vm3, %v465_v36, %v2362_v27  ;;  %v497_v27 = vld [vmem:[%s2852_s3] sm:$0xff]  ;;  %vm533_vm3 = vcmask 72704  }
  0xc2   : > { %v475_v45 = vsel %vm471_vm5, %v470_v41, %v2364_v31  ;;  %vm2135_vm5 = vmmov 0   ;;  %v260_v63 = vld [vmem:[%s2850_s1] sm:$0x7] }
  0xc3   : > { %v2374_v39 = vpop.permute.xlu0 %417  ;;  %v420_v40 = vpop.permute.xlu1 %419  ;;  %v480_v47 = vsel %vm476_vm6, %v475_v45, %v2368_v35  ;;  %v691_v9 = vrot.slane %v260_v63, %v2295_v6  ;;  %vm1255_vm6 = vcmask 760832  }
  0xc4   : > { %v426_v59 = vsel %vm425_vm12, %v2374_v39, %v420_v40  ;;  %v487_v29 = vsel %vm486_vm10, %v482_v24, %v2374_v39 }
  0xc5   : > { %v488_v17 = vsel %vm486_vm10, %v483_v12, %v426_v59 }
  0xc7   : > { %v2377_v42 = vpop.permute.xlu0 %421  ;;  %v450_v43 = vpop.permute.xlu1 %449 }
  0xc8   : > { %515 = vrot.lane.b32.xlu1 %v450_v43, %s2133_s13  ;;  %v427_v19 = vsel %vm425_vm12, %v420_v40, %v2377_v42 }
  0xc9   : > { %v489_v32 = vsel %vm486_vm10, %v484_v25, %v427_v19  ;;  %v699_v19 = vrot.slane %v260_v63, %v2292_v5 }
  0xcb   : > { %v452_v51 = vpop.permute.xlu0 %451  ;;  %v454_v52 = vpop.permute.xlu1 %453 }
  0xcc   : > { %v458_v55 = vsel %vm457_vm11, %v450_v43, %v452_v51  ;;  %v459_v56 = vsel %vm457_vm11, %v452_v51, %v454_v52 }
  0xcd   : > { %517 = vrot.lane.b32.xlu1 %v458_v55, %s2133_s13  ;;  %519 = vrot.lane.b32.xlu0 %v459_v56, %s2133_s13 }
  0xcf   : > { %v434_v13 = vpop.permute.xlu0 %433  ;;  %v436_v14 = vpop.permute.xlu1 %435 }
  0xd0   : > { %v442_v16 = vsel %vm441_vm13, %v434_v13, %v436_v14  ;;  %v492_v37 = vsel %vm491_vm14, %v487_v29, %v434_v13 }
  0xd1   : > { %v493_v20 = vsel %vm491_vm14, %v488_v17, %v442_v16  ;;  %v695_v17 = vrot.slane %v260_v63, %v2284_v4 }
  0xd2   : > { %509 = vrot.lane.b32.xlu0 %v493_v20, %s2133_s13 }
  0xd3   : > { %v438_v26 = vpop.permute.xlu0 %437  ;;  %v408_v28 = vpop.permute.xlu1 %407 }
  0xd4   : > { %v443_v30 = vsel %vm441_vm13, %v436_v14, %v438_v26  ;;  %v412_v43 = vsel %vm409_vm9, %v2372_v38, %v408_v28 }
  0xd5   : > { %v494_v33 = vsel %vm491_vm14, %v489_v32, %v443_v30  ;;  %v485_v8 = vsel %vm481_vm8, %v480_v47, %v412_v43  ;;  %vm1294_vm8 = vcmask 769024  }
  0xd6   : > { %511 = vrot.lane.b32.xlu1 %v494_v33, %s2133_s13  ;;  %507 = vrot.lane.b32.xlu0 %v492_v37, %s2133_s13 }
  0xd7   : > { %v424_v39 = vpop.permute.xlu0 %423  ;;  %v456_v40 = vpop.permute.xlu1 %455 }
  0xd8   : > { %v460_v44 = vsel %vm457_vm11, %v454_v52, %v456_v40  ;;  %v428_v46 = vsel %vm425_vm12, %v2377_v42, %v424_v39 }
  0xd9   : > { %v490_v48 = vsel %vm486_vm10, %v485_v8, %v428_v46  ;;  %vm1386_vm10 = vcmask 908288  }
  0xda   : > { %521 = vrot.lane.b32.xlu1 %v460_v44, %s2133_s13 }
  0xdb   : > { %v440_v21 = vpop.permute.xlu0 %439 }
  0xdc   : > { %v444_v38 = vsel %vm441_vm13, %v438_v26, %v440_v21 }
  0xdd   : > { %v495_v31 = vsel %vm491_vm14, %v490_v48, %v444_v38  ;;  %vm1409_vm14 = vcmask 916480  }
  0xde   : > { %513 = vrot.lane.b32.xlu0 %v495_v31, %s2133_s13  ;;  %500 = vperm.xlu1 %2027, %v497_v27  }
  0xe2   : > { %805 = vrot.lane.b32.xlu1 %v2124_v1, %s2856_s11  ;;  %743 = vrot.lane.b32.xlu0 %v2124_v1, %s2127_s28 }
  0xe6   : > { %794 = vrot.lane.b32.xlu1 %v2124_v1, %s2132_s12  ;;  %732 = vrot.lane.b32.xlu0 %v2124_v1, %s2860_s26 }
  0xea   : > { %783 = vrot.lane.b32.xlu1 %v2124_v1, %s2130_s10  ;;  %721 = vrot.lane.b32.xlu0 %v2124_v1, %s2858_s20 }
  0xee   : > { %772 = vrot.lane.b32.xlu1 %v2124_v1, %s2129_s9 }
 0x13a   : > { %v516_v35 = vpop.permute.xlu1 %515 }
 0x13f   : > { %v520_v42 = vpop.permute.xlu0 %519  ;;  %v518_v49 = vpop.permute.xlu1 %517 }
 0x140   : > { %v528_v50 = vsel %vm523_vm15, %v518_v49, %v520_v42  ;;  %v527_v51 = vsel %vm523_vm15, %v516_v35, %v518_v49 }
 0x141   : > { %1867 = vmatprep.subr.msk.mxu1 %vm461_vm2, %v528_v50 }
 0x142   : > { %1868 = vmatpush1.msk.msra.mxu1 %vm461_vm2, %v527_v51 }
 0x144   : > { %v510_v52 = vpop.permute.xlu0 %509 }
 0x148   : > { %v508_v53 = vpop.permute.xlu0 %507  ;;  %v512_v54 = vpop.permute.xlu1 %511 }
 0x149   : > { %v525_v55 = vsel %vm523_vm15, %v510_v52, %v512_v54  ;;  %v524_v56 = vsel %vm523_vm15, %v508_v53, %v510_v52 }
 0x14a   : > { %573 = vmatprep.subr.mxu1 %v525_v55 }
 0x14b   : > { %574 = vmatpush1.msra.mxu1 %v524_v56 }
 0x14c   : > { %1869 = vmatmul.mubr.msk.f32.vlgmr.msra.gmra.mxu1 %vm533_vm3, %v496_v57  ;;  %v522_v58 = vpop.permute.xlu1 %521  ;;  %1899 = vmatprep.subr.mxu1 %v2124_v1 }
 0x14d   : > { %v529_v59 = vsel %vm523_vm15, %v520_v42, %v522_v58  ;;  %1903 = vmatprep.mubr.msk.f32.mxu1 %vm2135_vm5, %v2124_v1  ;;  %vm1509_vm5 = vcmask 15360  }
 0x14e   : > { %1900 = vmatpush3.msk.msra.mxu1 %vm461_vm2, %v529_v59  ;;  %vm964_vm2 = vcmask 588800  }
 0x14f   : > { %1901 = vmatprep.subr.mxu1 %v2124_v1 }
 0x150   : > { %v514_v60 = vpop.permute.xlu0 %513 }
 0x151   : > { %v526_v61 = vsel %vm523_vm15, %v512_v54, %v514_v60 }
 0x152   : > { %1902 = vmatpush3.msra.mxu1 %v526_v61 }
 0x153   : > { %1904 = vmatmul.mubr.msk.f32.vlgmr.msra.gmra.mxu1 %vm533_vm3, %v496_v57  ;;  %vm1493_vm3 = vcmask 7168  }
 0x154   : > { %v744_v22 = vpop.permute.xlu0 %743 }
 0x158   : > { %v733_v24 = vpop.permute.xlu0 %732 }
 0x159   : > { %v501_v62 = vpop.permute.xlu1 %500 }
 0x15c   : > { %v722_v26 = vpop.permute.xlu0 %721 }
 0x15d   : > { %v2548_v5 = vpop.permute.xlu1 %805 }
 0x161   : > { %v2550_v23 = vpop.permute.xlu1 %794 }
 0x165   : > { %v2552_v25 = vpop.permute.xlu1 %783 }
 0x169   : > { %v2554_v28 = vpop.permute.xlu1 %772 }
 0x20c   : > { %v609_v3 = vpop.f32.mrf.mxu1 }
 0x20d   : > { %v610_v7 = vadd.f32 %v609_v3, %v501_v62 }
 0x20e   : > { %v611_v13 = vpop.f32.mrf.mxu1 }
 0x20f   : > { %v684_v12 = vmax.f32 %v610_v7, 0.0  ;;  %v612_v15 = vadd.f32 %v611_v13, %v501_v62 }
 0x211   : > { %v2492_v14 = vmul.f32 %v691_v9, %v684_v12  ;;  %v685_v6 = vmax.f32 %v612_v15, 0.0 }
 0x213   : > { %v680_v10 = vpop.f32.mrf.mxu1  ;;  %745 = vrot.lane.b32.xlu1 %v2492_v14, %s2127_s28  ;;  %799 = vrot.lane.b32.xlu0 %v2492_v14, %s2856_s11  ;;  %v2507_v11 = vmul.f32 %v695_v17, %v685_v6  ;;  %v2616_v6 = vld [vmem:[%s2853_s4] sm:$0xff] }
 0x214   : > { %v681_v4 = vadd.f32 %v680_v10, %v501_v62  ;;  %1924 = vmatprep.mubr.msk.f32.mxu1 %vm964_vm2, %v2616_v6 }
 0x215   : > { %v1905_v16 = vpop.f32.mrf.mxu1 }
 0x216   : > { %v686_v18 = vmax.f32 %v681_v4, 0.0  ;;  %v816_v4 = vld [vmem:[%s2854_s5 + $0x10] sm:$0xff] }
 0x217   : > { %734 = vrot.lane.b32.xlu1 %v2492_v14, %s2860_s26  ;;  %788 = vrot.lane.b32.xlu0 %v2492_v14, %s2132_s12 }
 0x218   : > { %v2530_v20 = vmul.f32 %v699_v19, %v686_v18  ;;  %v815_v18 = vld [vmem:[%s2854_s5 + $0x8] sm:$0xff] }
 0x21b   : > { %723 = vrot.lane.b32.xlu1 %v2492_v14, %s2858_s20  ;;  %777 = vrot.lane.b32.xlu0 %v2492_v14, %s2130_s10 }
 0x21f   : > { %801 = vrot.lane.b32.xlu1 %v2507_v11, %s2856_s11  ;;  %766 = vrot.lane.b32.xlu0 %v2492_v14, %s2129_s9 }
 0x223   : > { %790 = vrot.lane.b32.xlu1 %v2507_v11, %s2132_s12  ;;  %754 = vrot.lane.b32.xlu0 %v2492_v14, %s2128_s29 }
 0x227   : > { %779 = vrot.lane.b32.xlu1 %v2507_v11, %s2130_s10  ;;  %747 = vrot.lane.b32.xlu0 %v2507_v11, %s2127_s28 }
 0x22b   : > { %768 = vrot.lane.b32.xlu1 %v2507_v11, %s2129_s9  ;;  %736 = vrot.lane.b32.xlu0 %v2507_v11, %s2860_s26 }
 0x22f   : > { %756 = vrot.lane.b32.xlu1 %v2507_v11, %s2128_s29  ;;  %725 = vrot.lane.b32.xlu0 %v2507_v11, %s2858_s20 }
 0x233   : > { %749 = vrot.lane.b32.xlu1 %v2530_v20, %s2127_s28  ;;  %803 = vrot.lane.b32.xlu0 %v2530_v20, %s2856_s11  ;;  %s2865_s11 = smov 126  }
 0x237   : > { %738 = vrot.lane.b32.xlu1 %v2530_v20, %s2860_s26  ;;  %792 = vrot.lane.b32.xlu0 %v2530_v20, %s2132_s12  ;;  %s2140_s26 = smov 112  }
 0x23b   : > { %727 = vrot.lane.b32.xlu1 %v2530_v20, %s2858_s20  ;;  %781 = vrot.lane.b32.xlu0 %v2530_v20, %s2130_s10  ;;  %s2139_s20 = smov 111  }
 0x23f   : > { %770 = vrot.lane.b32.xlu0 %v2530_v20, %s2129_s9 }
 0x243   : > { %758 = vrot.lane.b32.xlu0 %v2530_v20, %s2128_s29 }
 0x285   : > { %v746_v29 = vpop.permute.xlu1 %745  ;;  %v800_v30 = vpop.permute.xlu0 %799 }
 0x286   : > { %902 = vrot.lane.b32.xlu0 %v800_v30, %s2133_s13  ;;  %v751_v47 = vsel %vm350_vm4, %v744_v22, %v746_v29 }
 0x289   : > { %v735_v32 = vpop.permute.xlu1 %734  ;;  %v789_v34 = vpop.permute.xlu0 %788 }
 0x28a   : > { %894 = vrot.lane.b32.xlu0 %v789_v34, %s2133_s13  ;;  %v740_v38 = vsel %vm334_vm1, %v733_v24, %v735_v32 }
 0x28d   : > { %v724_v33 = vpop.permute.xlu1 %723  ;;  %v778_v37 = vpop.permute.xlu0 %777 }
 0x28e   : > { %886 = vrot.lane.b32.xlu0 %v778_v37, %s2133_s13  ;;  %v729_v61 = vsel %vm318_vm0, %v722_v26, %v724_v33 }
 0x291   : > { %v802_v36 = vpop.permute.xlu1 %801  ;;  %v767_v39 = vpop.permute.xlu0 %766 }
 0x292   : > { %878 = vrot.lane.b32.xlu0 %v767_v39, %s2133_s13  ;;  %v807_v40 = vsel %vm457_vm11, %v800_v30, %v802_v36 }
 0x293   : > { %904 = vrot.lane.b32.xlu1 %v807_v40, %s2133_s13 }
 0x295   : > { %v791_v41 = vpop.permute.xlu1 %790  ;;  %v755_v43 = vpop.permute.xlu0 %754 }
 0x296   : > { %870 = vrot.lane.b32.xlu0 %v755_v43, %s2133_s13  ;;  %v796_v44 = vsel %vm441_vm13, %v789_v34, %v791_v41 }
 0x297   : > { %896 = vrot.lane.b32.xlu1 %v796_v44, %s2133_s13 }
 0x299   : > { %v780_v45 = vpop.permute.xlu1 %779  ;;  %v748_v46 = vpop.permute.xlu0 %747 }
 0x29a   : > { %862 = vrot.lane.b32.xlu0 %v751_v47, %s2133_s13  ;;  %v785_v8 = vsel %vm425_vm12, %v778_v37, %v780_v45  ;;  %v752_v50 = vsel %vm350_vm4, %v746_v29, %v748_v46 }
 0x29b   : > { %888 = vrot.lane.b32.xlu1 %v785_v8, %s2133_s13 }
 0x29d   : > { %v769_v21 = vpop.permute.xlu1 %768  ;;  %v737_v27 = vpop.permute.xlu0 %736 }
 0x29e   : > { %854 = vrot.lane.b32.xlu0 %v740_v38, %s2133_s13  ;;  %v774_v48 = vsel %vm409_vm9, %v767_v39, %v769_v21  ;;  %v741_v53 = vsel %vm334_vm1, %v735_v32, %v737_v27 }
 0x29f   : > { %880 = vrot.lane.b32.xlu1 %v774_v48, %s2133_s13 }
 0x2a1   : > { %v757_v31 = vpop.permute.xlu1 %756  ;;  %v726_v35 = vpop.permute.xlu0 %725 }
 0x2a2   : > { %v760_v42 = vsel %vm377_vm7, %v755_v43, %v757_v31  ;;  %v730_v56 = vsel %vm318_vm0, %v724_v33, %v726_v35 }
 0x2a3   : > { %872 = vrot.lane.b32.xlu1 %v760_v42, %s2133_s13 }
 0x2a5   : > { %v804_v49 = vpop.permute.xlu0 %803  ;;  %v750_v62 = vpop.permute.xlu1 %749 }
 0x2a6   : > { %v808_v51 = vsel %vm457_vm11, %v802_v36, %v804_v49  ;;  %v809_v7 = vsel %vm457_vm11, %v804_v49, %v2548_v5  ;;  %v753_v9 = vsel %vm350_vm4, %v748_v46, %v750_v62 }
 0x2a7   : > { %864 = vrot.lane.b32.xlu1 %v752_v50, %s2133_s13  ;;  %906 = vrot.lane.b32.xlu0 %v808_v51, %s2133_s13 }
 0x2a9   : > { %v793_v52 = vpop.permute.xlu0 %792  ;;  %v739_v63 = vpop.permute.xlu1 %738 }
 0x2aa   : > { %v797_v54 = vsel %vm441_vm13, %v791_v41, %v793_v52  ;;  %v798_v12 = vsel %vm441_vm13, %v793_v52, %v2550_v23  ;;  %v742_v13 = vsel %vm334_vm1, %v737_v27, %v739_v63 }
 0x2ab   : > { %856 = vrot.lane.b32.xlu1 %v741_v53, %s2133_s13  ;;  %898 = vrot.lane.b32.xlu0 %v797_v54, %s2133_s13 }
 0x2ad   : > { %v782_v55 = vpop.permute.xlu0 %781  ;;  %v728_v10 = vpop.permute.xlu1 %727 }
 0x2ae   : > { %v786_v57 = vsel %vm425_vm12, %v780_v45, %v782_v55  ;;  %v787_v15 = vsel %vm425_vm12, %v782_v55, %v2552_v25  ;;  %v731_v16 = vsel %vm318_vm0, %v726_v35, %v728_v10 }
 0x2af   : > { %848 = vrot.lane.b32.xlu1 %v730_v56, %s2133_s13  ;;  %890 = vrot.lane.b32.xlu0 %v786_v57, %s2133_s13 }
 0x2b1   : > { %v771_v58 = vpop.permute.xlu0 %770 }
 0x2b2   : > { %v775_v59 = vsel %vm409_vm9, %v769_v21, %v771_v58  ;;  %v776_v17 = vsel %vm409_vm9, %v771_v58, %v2554_v28 }
 0x2b3   : > { %882 = vrot.lane.b32.xlu0 %v775_v59, %s2133_s13 }
 0x2b5   : > { %v759_v60 = vpop.permute.xlu0 %758 }
 0x2b6   : > { %876 = vrot.lane.b32.xlu1 %v759_v60, %s2133_s13  ;;  %v761_v3 = vsel %vm377_vm7, %v757_v31, %v759_v60 }
 0x2b7   : > { %846 = vrot.lane.b32.xlu0 %v729_v61, %s2133_s13 }
 0x2ba   : > { %868 = vrot.lane.b32.xlu1 %v750_v62, %s2133_s13 }
 0x2bb   : > { %842 = vrot.lane.b32.xlu0 %v2507_v11, %s2133_s13  ;;  %v814_v11 = vld [vmem:[%s2854_s5] sm:$0xff] }
 0x2be   : > { %860 = vrot.lane.b32.xlu1 %v739_v63, %s2133_s13 }
 0x2bf   : > { %874 = vrot.lane.b32.xlu0 %v761_v3, %s2133_s13 }
 0x2c2   : > { %908 = vrot.lane.b32.xlu1 %v809_v7, %s2133_s13 }
 0x2c3   : > { %866 = vrot.lane.b32.xlu0 %v753_v9, %s2133_s13 }
 0x2c6   : > { %900 = vrot.lane.b32.xlu1 %v798_v12, %s2133_s13 }
 0x2c7   : > { %858 = vrot.lane.b32.xlu0 %v742_v13, %s2133_s13 }
 0x2ca   : > { %892 = vrot.lane.b32.xlu1 %v787_v15, %s2133_s13 }
 0x2cb   : > { %850 = vrot.lane.b32.xlu0 %v731_v16, %s2133_s13 }
 0x2ce   : > { %884 = vrot.lane.b32.xlu1 %v776_v17, %s2133_s13 }
 0x2cf   : > { %838 = vrot.lane.b32.xlu0 %v2124_v1, %s2133_s13 }
 0x2d2   : > { %852 = vrot.lane.b32.xlu1 %v728_v10, %s2133_s13 }
 0x2d3   : > { %825 = vperm.xlu0 %2028, %v815_v18  }
 0x2d6   : > { %840 = vrot.lane.b32.xlu1 %v2492_v14, %s2133_s13  ;;  %v817_v14 = vld [vmem:[%s2854_s5 + $0x18] sm:$0x1] }
 0x2da   : > { %844 = vrot.lane.b32.xlu1 %v2530_v20, %s2133_s13 }
 0x2de   : > { %820 = vperm.xlu1 %2027, %v814_v11  }
 0x2e2   : > { %830 = vperm.xlu1 %2027, %v816_v4  }
 0x2e6   : > { %835 = vperm.xlu1 %2027, %v817_v14  }
 0x2f8   : > { %v903_v19 = vpop.permute.xlu0 %902 }
 0x2fc   : > { %v895_v20 = vpop.permute.xlu0 %894 }
 0x300   : > { %v887_v5 = vpop.permute.xlu0 %886 }
 0x304   : > { %v879_v22 = vpop.permute.xlu0 %878 }
 0x305   : > { %v905_v23 = vpop.permute.xlu1 %904 }
 0x306   : > { %v934_v36 = vsel %vm523_vm15, %v903_v19, %v905_v23 }
 0x308   : > { %v871_v24 = vpop.permute.xlu0 %870 }
 0x309   : > { %v897_v25 = vpop.permute.xlu1 %896 }
 0x30a   : > { %v931_v43 = vsel %vm523_vm15, %v895_v20, %v897_v25 }
 0x30c   : > { %v863_v28 = vpop.permute.xlu0 %862 }
 0x30d   : > { %v889_v26 = vpop.permute.xlu1 %888 }
 0x30e   : > { %v928_v46 = vsel %vm523_vm15, %v887_v5, %v889_v26 }
 0x310   : > { %v855_v30 = vpop.permute.xlu0 %854 }
 0x311   : > { %v881_v29 = vpop.permute.xlu1 %880 }
 0x312   : > { %v925_v27 = vsel %vm523_vm15, %v879_v22, %v881_v29  ;;  %v811_v22 = vld [vmem:[%s2853_s4 + $0x8] sm:$0xff] }
 0x315   : > { %v873_v32 = vpop.permute.xlu1 %872 }
 0x316   : > { %v922_v51 = vsel %vm523_vm15, %v871_v24, %v873_v32 }
 0x319   : > { %v865_v34 = vpop.permute.xlu1 %864  ;;  %v907_v33 = vpop.permute.xlu0 %906 }
 0x31a   : > { %v935_v37 = vsel %vm523_vm15, %v905_v23, %v907_v33  ;;  %v919_v56 = vsel %vm523_vm15, %v863_v28, %v865_v34  ;;  %v812_v23 = vld [vmem:[%s2853_s4 + $0x10] sm:$0xff] }
 0x31b   : > { %991 = vmatprep.subr.mxu0 %v935_v37 }
 0x31c   : > { %992 = vmatpush1.msra.mxu0 %v934_v36 }
 0x31d   : > { %v899_v39 = vpop.permute.xlu0 %898  ;;  %v857_v40 = vpop.permute.xlu1 %856 }
 0x31e   : > { %v932_v41 = vsel %vm523_vm15, %v897_v25, %v899_v39  ;;  %v916_v61 = vsel %vm523_vm15, %v855_v30, %v857_v40  ;;  %v2136_v25 = vmov 1966171168  }
 0x31f   : > { %993 = vmatprep.subr.mxu0 %v932_v41 }
 0x320   : > { %994 = vmatpush1.msra.mxu0 %v931_v43 }
 0x321   : > { %v891_v44 = vpop.permute.xlu0 %890  ;;  %v849_v47 = vpop.permute.xlu1 %848 }
 0x322   : > { %v929_v45 = vsel %vm523_vm15, %v889_v26, %v891_v44  ;;  %v1187_v26 = vunpack.c.l.s4 %v2136_v25 }
 0x323   : > { %995 = vmatprep.subr.mxu0 %v929_v45 }
 0x324   : > { %996 = vmatpush1.msra.mxu0 %v928_v46 }
 0x325   : > { %v883_v8 = vpop.permute.xlu0 %882 }
 0x326   : > { %v926_v21 = vsel %vm523_vm15, %v881_v29, %v883_v8 }
 0x327   : > { %997 = vmatprep.subr.mxu0 %v926_v21 }
 0x328   : > { %v877_v38 = vpop.permute.xlu1 %876  ;;  %998 = vmatpush1.msra.mxu0 %v925_v27 }
 0x329   : > { %v847_v48 = vpop.permute.xlu0 %846 }
 0x32a   : > { %v913_v9 = vsel %vm523_vm15, %v847_v48, %v849_v47 }
 0x32c   : > { %v869_v31 = vpop.permute.xlu1 %868 }
 0x32d   : > { %v843_v35 = vpop.permute.xlu0 %842 }
 0x330   : > { %v861_v42 = vpop.permute.xlu1 %860 }
 0x331   : > { %v875_v49 = vpop.permute.xlu0 %874 }
 0x332   : > { %v923_v50 = vsel %vm523_vm15, %v873_v32, %v875_v49  ;;  %v924_v10 = vsel %vm523_vm15, %v875_v49, %v877_v38 }
 0x333   : > { %999 = vmatprep.subr.mxu0 %v923_v50 }
 0x334   : > { %v909_v52 = vpop.permute.xlu1 %908  ;;  %1000 = vmatpush1.msra.mxu0 %v922_v51 }
 0x335   : > { %v867_v53 = vpop.permute.xlu0 %866  ;;  %v936_v54 = vsel %vm523_vm15, %v907_v33, %v909_v52  ;;  %v1188_v33 = vunpack.c.0.s8 %v1187_v26 }
 0x336   : > { %1906 = vmatprep.subr.mxu1 %v936_v54  ;;  %v920_v55 = vsel %vm523_vm15, %v865_v34, %v867_v53  ;;  %v921_v16 = vsel %vm523_vm15, %v867_v53, %v869_v31 }
 0x337   : > { %1001 = vmatprep.subr.mxu0 %v920_v55  ;;  %1907 = vmatpush3.msra.mxu1 %v936_v54  ;;  %v2692_v45 = vsub.s32 %v1188_v33, %v2280_v2 }
 0x338   : > { %v901_v57 = vpop.permute.xlu1 %900  ;;  %1002 = vmatpush1.msra.mxu0 %v919_v56 }
 0x339   : > { %v859_v58 = vpop.permute.xlu0 %858  ;;  %v933_v59 = vsel %vm523_vm15, %v899_v39, %v901_v57 }
 0x33a   : > { %1908 = vmatprep.subr.mxu1 %v933_v59  ;;  %v917_v60 = vsel %vm523_vm15, %v857_v40, %v859_v58  ;;  %v918_v11 = vsel %vm523_vm15, %v859_v58, %v861_v42 }
 0x33b   : > { %1003 = vmatprep.subr.mxu0 %v917_v60  ;;  %1909 = vmatpush3.msra.mxu1 %v933_v59 }
 0x33c   : > { %v893_v62 = vpop.permute.xlu1 %892  ;;  %1004 = vmatpush1.msra.mxu0 %v916_v61 }
 0x33d   : > { %v851_v63 = vpop.permute.xlu0 %850  ;;  %v930_v3 = vsel %vm523_vm15, %v891_v44, %v893_v62 }
 0x33e   : > { %1910 = vmatprep.subr.mxu1 %v930_v3  ;;  %v914_v7 = vsel %vm523_vm15, %v849_v47, %v851_v63 }
 0x33f   : > { %1005 = vmatprep.subr.mxu0 %v914_v7  ;;  %1911 = vmatpush3.msra.mxu1 %v930_v3 }
 0x340   : > { %v885_v12 = vpop.permute.xlu1 %884  ;;  %1006 = vmatpush1.msra.mxu0 %v913_v9 }
 0x341   : > { %v927_v13 = vsel %vm523_vm15, %v883_v8, %v885_v12  ;;  %v839_v17 = vpop.permute.xlu0 %838 }
 0x342   : > { %1912 = vmatprep.subr.mxu1 %v927_v13 }
 0x343   : > { %1913 = vmatpush3.msra.mxu1 %v927_v13 }
 0x344   : > { %v853_v15 = vpop.permute.xlu1 %852  ;;  %1914 = vmatprep.subr.mxu1 %v924_v10 }
 0x345   : > { %1915 = vmatpush3.msra.mxu1 %v924_v10  ;;  %v915_v14 = vsel %vm523_vm15, %v851_v63, %v853_v15  ;;  %v2030_v10 = vld [vmem:[#allocation4] sm:$0xff] }
 0x346   : > { %1916 = vmatprep.subr.mxu1 %v921_v16 }
 0x347   : > { %1917 = vmatpush3.msra.mxu1 %v921_v16 }
 0x348   : > { %v841_v4 = vpop.permute.xlu1 %840  ;;  %1918 = vmatprep.subr.mxu1 %v918_v11 }
 0x349   : > { %1919 = vmatpush3.msra.mxu1 %v918_v11  ;;  %v911_v18 = vsel %vm523_vm15, %v841_v4, %v843_v35  ;;  %v910_v19 = vsel %vm523_vm15, %v839_v17, %v841_v4 }
 0x34a   : > { %1007 = vmatprep.subr.mxu0 %v911_v18  ;;  %1920 = vmatprep.subr.mxu1 %v915_v14 }
 0x34b   : > { %1008 = vmatpush1.msra.mxu0 %v910_v19  ;;  %1921 = vmatpush3.msra.mxu1 %v915_v14 }
 0x34c   : > { %v845_v20 = vpop.permute.xlu1 %844  ;;  %1872 = vmatmul.mubr.msk.f32.vlgmr.msra.gmra.mxu0 %vm964_vm2, %v2616_v6  ;;  %v813_v6 = vld [vmem:[%s2853_s4 + $0x18] sm:$0x1] }
 0x34d   : > { %v912_v5 = vsel %vm523_vm15, %v843_v35, %v845_v20  ;;  %1047 = vmatprep.mubr.f32.mxu0 %v2124_v1 }
 0x34e   : > { %1922 = vmatprep.subr.mxu1 %v912_v5  ;;  %v826_v34 = vpop.permute.xlu0 %825 }
 0x34f   : > { %1923 = vmatpush3.msra.mxu1 %v912_v5 }
 0x350   : > { %1873 = vmatmul.mubr.msk.f32.gmra.mxu0 %vm964_vm2, %v811_v22  ;;  %1925 = vmatmul.mubr.msk.f32.vlgmr.msra.gmra.mxu1 %vm964_vm2, %v811_v22 }
 0x351   : > { %1053 = vmatprep.mubr.f32.mxu0 %v2124_v1  ;;  %1927 = vmatprep.mubr.msk.f32.mxu1 %vm964_vm2, %v812_v23 }
 0x354   : > { %1874 = vmatmul.mubr.msk.f32.gmra.mxu0 %vm964_vm2, %v812_v23  ;;  %1928 = vmatmul.mubr.msk.f32.gmra.mxu1 %vm964_vm2, %v813_v6 }
 0x355   : > { %1059 = vmatprep.mubr.f32.mxu0 %v2124_v1 }
 0x358   : > { %1875 = vmatmul.mubr.msk.f32.gmra.mxu0 %vm964_vm2, %v813_v6 }
 0x359   : > { %v821_v24 = vpop.permute.xlu1 %820 }
 0x35d   : > { %v831_v29 = vpop.permute.xlu1 %830 }
 0x361   : > { %v836_v46 = vpop.permute.xlu1 %835 }
 0x40c   : > { %v1043_v28 = vpop.f32.mrf.mxu0 }
 0x40d   : > { %v1044_v30 = vadd.f32 %v1043_v28, %v821_v24 }
 0x40e   : > { %v1045_v32 = vpop.f32.mrf.mxu0 }
 0x40f   : > { %v1046_v37 = vadd.f32 %v1045_v32, %v821_v24 }
 0x410   : > { %v1049_v36 = vpop.f32.mrf.mxu0  ;;  %v1926_v39 = vpop.f32.mrf.mxu1 }
 0x411   : > { %v1050_v40 = vadd.f32 %v1049_v36, %v826_v34  ;;  %v2689_v41 = vadd.f32 %v1926_v39, %v826_v34  ;;  %v1184_v21 = vcombine.low %v1044_v30, %v1046_v37  ;;  %v1267_v51 = vcombine.high %v1044_v30, %v1046_v37 }
 0x412   : > { %v1051_v43 = vpop.f32.mrf.mxu0  ;;  %v1132_v44 = vpop.f32.mrf.mxu1 }
 0x413   : > { %v1052_v47 = vadd.f32 %v1051_v43, %v826_v34  ;;  %v1133_v8 = vadd.f32 %v1132_v44, %v821_v24  ;;  %v1192_v53 = vrot.slane %v1184_v21, %v2692_v45  ;;  %v1275_v63 = vrot.slane %v1267_v51, %v2692_v45 }
 0x414   : > { %v1055_v27 = vpop.f32.mrf.mxu0  ;;  %v1929_v38 = vpop.f32.mrf.mxu1  ;;  %v1360_v15 = vcombine.low %v2689_v41, %v2030_v10  ;;  %v1450_v20 = vcombine.high %v2689_v41, %v2030_v10 }
 0x415   : > { %v2694_v48 = vadd.f32 %v1055_v27, %v831_v29  ;;  %v1148_v31 = vadd.f32 %v1929_v38, %v836_v46  ;;  %v1185_v35 = vcombine.low %v1133_v8, %v2124_v1  ;;  %v1268_v42 = vcombine.high %v1133_v8, %v2124_v1 }
 0x416   : > { %v1057_v49 = vpop.f32.mrf.mxu0  ;;  %v1142_v50 = vpop.f32.mrf.mxu1  ;;  %v1359_v9 = vcombine.low %v1050_v40, %v1052_v47  ;;  %v1374_v4 = vrot.slane %v1360_v15, %v2692_v45  ;;  %v1449_v18 = vcombine.high %v1050_v40, %v1052_v47  ;;  %v1464_v24 = vrot.slane %v1450_v20, %v2692_v45 }
 0x417   : > { %1162 = vst [vmem:[#allocation4 + $0x70] sm:$0x1] %v1148_v31  ;;  %v2698_v52 = vadd.f32 %v1057_v49, %v831_v29  ;;  %v2700_v2 = vadd.f32 %v1142_v50, %v831_v29  ;;  %v1199_v54 = vrot.slane %v1185_v35, %v2692_v45  ;;  %v1282_v59 = vrot.slane %v1268_v42, %v2692_v45 }
 0x418   : > { %v1061_v55 = vpop.f32.mrf.mxu0  ;;  %v1367_v17 = vrot.slane %v1359_v9, %v2692_v45  ;;  %v1457_v23 = vrot.slane %v1449_v18, %v2692_v45 }
 0x419   : > { %v1062_v56 = vadd.f32 %v1061_v55, %v836_v46  ;;  %v1216_v57 = vcombine.high %v1192_v53, %v1199_v54  ;;  %v1200_v58 = vcombine.low %v1192_v53, %v1199_v54  ;;  %v1283_v7 = vcombine.low %v1275_v63, %v1282_v59 }
 0x41a   : > { %v1063_v60 = vpop.f32.mrf.mxu0  ;;  %v1306_v13 = vcombine.high %v1275_v63, %v1282_v59  ;;  %v1375_v19 = vcombine.low %v1367_v17, %v1374_v4  ;;  %v1398_v22 = vcombine.high %v1367_v17, %v1374_v4  ;;  %v1465_v26 = vcombine.low %v1457_v23, %v1464_v24  ;;  %v2756_v63 = vld [vmem:[%s2289_s19 + $0x1] sm:$0xf] }
 0x41b   : > { %1160 = vst [vmem:[#allocation4 + $0x20] sm:$0x1] %v1062_v56  ;;  %v1064_v1 = vadd.f32 %v1063_v60, %v836_v46  ;;  %v1223_v61 = vrot.slane %v1216_v57, %v2692_v45  ;;  %v2707_v62 = vrot.slane %v1200_v58, %v2692_v45  ;;  %v1290_v16 = vrot.slane %v1283_v7, %v2692_v45 }
 0x41c   : > { %v1313_v11 = vrot.slane %v1306_v13, %v2692_v45  ;;  %v1382_v6 = vrot.slane %v1375_v19, %v2692_v45  ;;  %v1405_v25 = vrot.slane %v1398_v22, %v2692_v45  ;;  %v1541_v28 = vcombine.low %v2694_v48, %v2698_v52 }
 0x41d   : > { %1161 = vst [vmem:[#allocation4 + $0x48] sm:$0x1] %v1064_v1  ;;  %1224 = vrot.lane.b32.xlu0 %v1223_v61, %s2132_s12  ;;  %v1237_v3 = vcombine.high %v2707_v62, %v2707_v62  ;;  %v1251_v12 = vcombine.high %v1223_v61, %v1223_v61  ;;  %v1327_v14 = vcombine.high %v1290_v16, %v1290_v16 }
 0x41e   : > { %v1341_v5 = vcombine.high %v1313_v11, %v1313_v11  ;;  %v1542_v29 = vcombine.low %v2700_v2, %v2030_v10  ;;  %v1421_v30 = vcombine.high %v1382_v6, %v1382_v6  ;;  %v1482_v32 = vcombine.high %v1457_v23, %v1464_v24  ;;  %v1177_v31 = vld [vmem:[#allocation4 + $0x70] sm:$0x1] }
 0x41f   : > { %1238 = vrot.lane.b32.xlu1 %v1237_v3, %s2130_s10  ;;  %v1435_v34 = vcombine.high %v1405_v25, %v1405_v25  ;;  %v2732_v33 = vrot.slane %v1465_v26, %v2692_v45  ;;  %v1549_v37 = vrot.slane %v1541_v28, %v2692_v45  ;;  %v1633_v43 = vcombine.high %v2694_v48, %v2698_v52  ;;  %v1178_v48 = vld [vmem:[#allocation4 + $0x90] sm:$0x1] }
 0x420   : > { %v1556_v36 = vrot.slane %v1542_v29, %v2692_v45  ;;  %v1489_v39 = vrot.slane %v1482_v32, %v2692_v45  ;;  %v1634_v44 = vcombine.high %v2700_v2, %v2030_v10  ;;  %v1732_v52 = vcombine.low %v1177_v31, %v1178_v48 }
 0x421   : > { %1252 = vrot.lane.b32.xlu0 %v1251_v12, %s2137_s18  ;;  %v1505_v40 = vcombine.high %v2732_v33, %v2732_v33  ;;  %s2143_s18 = smov 16   ;;  %v1641_v21 = vrot.slane %v1633_v43, %v2692_v45 }
 0x422   : > { %v1557_v41 = vcombine.low %v1549_v37, %v1556_v36  ;;  %v1521_v46 = vcombine.high %v1489_v39, %v1489_v39  ;;  %v1580_v47 = vcombine.high %v1549_v37, %v1556_v36  ;;  %v1648_v27 = vrot.slane %v1634_v44, %v2692_v45 }
 0x423   : > { %1291 = vrot.lane.b32.xlu1 %v1290_v16, %s2138_s14  ;;  %s2144_s14 = smov 17   ;;  %v1746_v55 = vrot.slane %v1732_v52, %v2692_v45 }
 0x424   : > { %v1564_v8 = vrot.slane %v1557_v41, %v2692_v45  ;;  %v1587_v38 = vrot.slane %v1580_v47, %v2692_v45  ;;  %v1649_v42 = vcombine.low %v1641_v21, %v1648_v27  ;;  %v2029_v49 = vld [vmem:[#allocation4 + $0x20] ss:$40 sps:$4 sm:$0x11]   ;;  %v1672_v51 = vcombine.high %v1641_v21, %v1648_v27 }
 0x425   : > { %1314 = vrot.lane.b32.xlu0 %v1313_v11, %s2129_s9  ;;  %v1739_v53 = vrot.slane %v2029_v49, %v2692_v45 }
 0x426   : > { %v1602_v35 = vcombine.high %v1564_v8, %v1564_v8  ;;  %v1617_v50 = vcombine.high %v1587_v38, %v1587_v38  ;;  %v1656_v2 = vrot.slane %v1649_v42, %v2692_v45  ;;  %v1679_v54 = vrot.slane %v1672_v51, %v2692_v45 }
 0x427   : > { %1328 = vrot.lane.b32.xlu1 %v1327_v14, %s2128_s29  ;;  %v1747_v57 = vcombine.low %v1739_v53, %v1746_v55 }
 0x428   : > { %v1695_v56 = vcombine.high %v1656_v2, %v1656_v2  ;;  %v1711_v58 = vcombine.high %v1679_v54, %v1679_v54 }
 0x429   : > { %1342 = vrot.lane.b32.xlu0 %v1341_v5, %s2127_s28  ;;  %v1754_v59 = vrot.slane %v1747_v57, %v2692_v45 }
 0x42b   : > { %1383 = vrot.lane.b32.xlu1 %v1382_v6, %s2139_s20  ;;  %s2145_s20 = smov 18  }
 0x42d   : > { %1406 = vrot.lane.b32.xlu0 %v1405_v25, %s2140_s26  ;;  %s2146_s26 = smov 20  }
 0x42f   : > { %1422 = vrot.lane.b32.xlu1 %v1421_v30, %s2865_s11 }
 0x431   : > { %1436 = vrot.lane.b32.xlu0 %v1435_v34, %s2866_s15 }
 0x433   : > { %1490 = vrot.lane.b32.xlu1 %v1489_v39, %s2141_s16  ;;  %s2147_s16 = smov 34  }
 0x435   : > { %1506 = vrot.lane.b32.xlu0 %v1505_v40, %s2142_s17  ;;  %s2148_s17 = smov 35  }
 0x437   : > { %1522 = vrot.lane.b32.xlu1 %v1521_v46, %s2143_s18  ;;  %s2150_s18 = smov 37  }
 0x439   : > { %1565 = vrot.lane.b32.xlu0 %v1564_v8, %s2144_s14  ;;  %s2151_s14 = smov 38  }
 0x43b   : > { %1588 = vrot.lane.b32.xlu1 %v1587_v38, %s2145_s20  ;;  %s2867_s20 = smov 90  }
 0x43d   : > { %1603 = vrot.lane.b32.xlu0 %v1602_v35, %s2133_s13  ;;  %s2149_s13 = smov 36  }
 0x43f   : > { %1618 = vrot.lane.b32.xlu1 %v1617_v50, %s2146_s26  ;;  %s2152_s26 = smov 125   ;;  %v1474_v50 = vmul.f32 %v2732_v33, %v2756_v63 }
 0x441   : > { %1657 = vrot.lane.b32.xlu0 %v1656_v2, %s2147_s16  ;;  %s2160_s16 = smov 72  }
 0x443   : > { %1680 = vrot.lane.b32.xlu1 %v1679_v54, %s2148_s17  ;;  %s2161_s17 = smov 71  }
 0x445   : > { %1696 = vrot.lane.b32.xlu0 %v1695_v56, %s2149_s13  ;;  %s2162_s13 = smov 70  }
 0x447   : > { %1712 = vrot.lane.b32.xlu1 %v1711_v58, %s2150_s18  ;;  %s2163_s18 = smov 56  }
 0x449   : > { %1755 = vrot.lane.b32.xlu0 %v1754_v59, %s2151_s14  ;;  %s2164_s14 = smov 55  }
 0x44b   : > { %1208 = vrot.lane.b32.xlu1 %v2707_v62, %s2867_s20 }
 0x48f   : > { %v1225_v60 = vpop.permute.xlu0 %1224 }
 0x490   : > { %v1226_v1 = vrot.slane %v1225_v60, 1 }
 0x491   : > { %v1239_v61 = vpop.permute.xlu1 %1238 }
 0x492   : > { %v1227_v3 = vsel %vm441_vm13, %v1225_v60, %v1226_v1  ;;  %v1240_v7 = vrot.slane %v1239_v61, 1 }
 0x493   : > { %v1229_v9 = vmul.f32 %v1227_v3, %v2756_v63  ;;  %v1253_v12 = vpop.permute.xlu0 %1252 }
 0x494   : > { %v1241_v13 = vsel %vm425_vm12, %v1239_v61, %v1240_v7  ;;  %v1254_v45 = vrot.slane %v1253_v12, 1 }
 0x495   : > { %v1243_v10 = vmul.f32 %v1241_v13, %v2756_v63  ;;  %v1292_v15 = vpop.permute.xlu1 %1291  ;;  %1231 = vrot.lane.b32.xlu0 %v1229_v9, %s2866_s15  ;;  %s2153_s15 = smov 124  }
 0x496   : > { %v1256_v62 = vsel %vm1255_vm6, %v1253_v12, %v1254_v45  ;;  %v1293_v16 = vrot.slane %v1292_v15, 1  ;;  %vm1525_vm6 = vcmask 130048  }
 0x497   : > { %v1258_v17 = vmul.f32 %v1256_v62, %v2756_v63  ;;  %1245 = vrot.lane.b32.xlu1 %v1243_v10, %s2865_s11  ;;  %v1315_v11 = vpop.permute.xlu0 %1314  ;;  %s2159_s11 = smov 73  }
 0x498   : > { %v1295_v4 = vsel %vm1294_vm8, %v1292_v15, %v1293_v16  ;;  %v1316_v18 = vrot.slane %v1315_v11, 1  ;;  %vm1568_vm8 = vcmask 138240  }
 0x499   : > { %v1297_v14 = vmul.f32 %v1295_v4, %v2756_v63  ;;  %v1329_v19 = vpop.permute.xlu1 %1328  ;;  %1260 = vrot.lane.b32.xlu0 %v1258_v17, %s2152_s26  ;;  %s2166_s26 = smov 53  }
 0x49a   : > { %v1317_v20 = vsel %vm409_vm9, %v1315_v11, %v1316_v18  ;;  %v1330_v5 = vrot.slane %v1329_v19, 1 }
 0x49b   : > { %v1319_v22 = vmul.f32 %v1317_v20, %v2756_v63  ;;  %1299 = vrot.lane.b32.xlu1 %v1297_v14, %s2153_s15  ;;  %v1343_v23 = vpop.permute.xlu0 %1342  ;;  %s2167_s15 = smov 52  }
 0x49c   : > { %v1331_v6 = vsel %vm377_vm7, %v1329_v19, %v1330_v5  ;;  %v1344_v24 = vrot.slane %v1343_v23, 1 }
 0x49d   : > { %v1333_v25 = vmul.f32 %v1331_v6, %v2756_v63  ;;  %v1384_v26 = vpop.permute.xlu1 %1383  ;;  %1321 = vrot.lane.b32.xlu0 %v1319_v22, %s2127_s28  ;;  %s2154_s28 = smov 107  }
 0x49e   : > { %v1345_v28 = vsel %vm350_vm4, %v1343_v23, %v1344_v24  ;;  %v1385_v29 = vrot.slane %v1384_v26, 1 }
 0x49f   : > { %v1347_v30 = vmul.f32 %v1345_v28, %v2756_v63  ;;  %1335 = vrot.lane.b32.xlu1 %v1333_v25, %s2128_s29  ;;  %v1407_v32 = vpop.permute.xlu0 %1406  ;;  %s2155_s29 = smov 106  }
 0x4a0   : > { %v1387_v34 = vsel %vm1386_vm10, %v1384_v26, %v1385_v29  ;;  %v1408_v37 = vrot.slane %v1407_v32, 1  ;;  %vm1591_vm10 = vcmask 146432  }
 0x4a1   : > { %v1389_v36 = vmul.f32 %v1387_v34, %v2756_v63  ;;  %v1423_v39 = vpop.permute.xlu1 %1422  ;;  %1349 = vrot.lane.b32.xlu0 %v1347_v30, %s2129_s9  ;;  %s2156_s9 = smov 89  }
 0x4a2   : > { %v1410_v40 = vsel %vm1409_vm14, %v1407_v32, %v1408_v37  ;;  %v1424_v41 = vrot.slane %v1423_v39, 1  ;;  %vm1621_vm14 = vcmask 162816  }
 0x4a3   : > { %v1412_v43 = vmul.f32 %v1410_v40, %v2756_v63  ;;  %1391 = vrot.lane.b32.xlu1 %v1389_v36, %s2154_s28  ;;  %v1437_v44 = vpop.permute.xlu0 %1436  ;;  %v1179_v36 = vld [vmem:[%s2289_s19 + $0x1] sm:$0x7]  ;;  %s253_s19 = sand.u32 1, %s2113_s22  }
 0x4a4   : > { %v1425_v46 = vsel %vm334_vm1, %v1423_v39, %v1424_v41  ;;  %v1438_v47 = vrot.slane %v1437_v44, 1  ;;  %s1930_s28 = smul.u32 3, %s253_s19 }
 0x4a5   : > { %v1427_v8 = vmul.f32 %v1425_v46, %v2756_v63  ;;  %v1491_v21 = vpop.permute.xlu1 %1490  ;;  %1414 = vrot.lane.b32.xlu0 %v1412_v43, %s2155_s29  ;;  %s1932_s29 = smul.u32 48, %s2225_s25  ;;  %s2168_s25 = smov [#allocation8]  }
 0x4a6   : > { %v1439_v27 = vsel %vm318_vm0, %v1437_v44, %v1438_v47  ;;  %v1492_v38 = vrot.slane %v1491_v21, 7 }
 0x4a7   : > { %v1441_v31 = vmul.f32 %v1439_v27, %v2756_v63  ;;  %1429 = vrot.lane.b32.xlu1 %v1427_v8, %s2130_s10  ;;  %v1507_v48 = vpop.permute.xlu0 %1506  ;;  %s2157_s10 = smov 88  }
 0x4a8   : > { %v1494_v35 = vsel %vm1493_vm3, %v1492_v38, %v1491_v21  ;;  %v1508_v42 = vrot.slane %v1507_v48, 7  ;;  %vm1660_vm3 = vcmask 277504  }
 0x4a9   : > { %v1523_v49 = vpop.permute.xlu1 %1522  ;;  %1443 = vrot.lane.b32.xlu0 %v1441_v31, %s2132_s12  ;;  %v1496_v2 = vmul.f32 %v1494_v35, %v2756_v63  ;;  %s2158_s12 = smov 74  }
 0x4aa   : > { %v1510_v51 = vsel %vm1509_vm5, %v1508_v42, %v1507_v48  ;;  %v1524_v52 = vrot.slane %v1523_v49, 7  ;;  %vm1683_vm5 = vcmask 285696  }
 0x4ab   : > { %1476 = vrot.lane.b32.xlu1 %v1474_v50, %s2867_s20  ;;  %v1566_v53 = vpop.permute.xlu0 %1565  ;;  %v1512_v56 = vmul.f32 %v1510_v51, %v2756_v63  ;;  %s2165_s20 = smov 54  }
 0x4ac   : > { %v1526_v54 = vsel %vm1525_vm6, %v1524_v52, %v1523_v49  ;;  %v1567_v55 = vrot.slane %v1566_v53, 7  ;;  %vm1715_vm6 = vcmask 302080  }
 0x4ad   : > { %v1589_v57 = vpop.permute.xlu1 %1588  ;;  %1498 = vrot.lane.b32.xlu0 %v1496_v2, %s2156_s9  ;;  %v1528_v33 = vmul.f32 %v1526_v54, %v2756_v63  ;;  %s255_s9 = scalar_lea.vmem [#allocation8], %s1930_s28 }
 0x4ae   : > { %v1569_v58 = vsel %vm1568_vm8, %v1567_v55, %v1566_v53  ;;  %v1590_v59 = vrot.slane %v1589_v57, 7  ;;  %vm1758_vm8 = vcmask 310272  }
 0x4af   : > { %1514 = vrot.lane.b32.xlu1 %v1512_v56, %s2157_s10  ;;  %v1604_v60 = vpop.permute.xlu0 %1603  ;;  %v1571_v3 = vmul.f32 %v1569_v58, %v2756_v63  ;;  %s1790_s10 = sshll.u32 %s255_s9, 4  ;;  %s1791_s10 = int_to_ptr.vmem [resolvable:$true] %s1790_s10 }
 0x4b0   : > { %v1592_v1 = vsel %vm1591_vm10, %v1590_v59, %v1589_v57  ;;  %v1605_v61 = vrot.slane %v1604_v60, 7  ;;  %vm1263_vm10 = vcmask 1022976  }
 0x4b1   : > { %v1619_v7 = vpop.permute.xlu1 %1618  ;;  %1530 = vrot.lane.b32.xlu0 %v1528_v33, %s2158_s12  ;;  %v1594_v13 = vmul.f32 %v1592_v1, %v2756_v63 }
 0x4b2   : > { %v1606_v9 = vsel %vm523_vm15, %v1605_v61, %v1604_v60  ;;  %v1620_v12 = vrot.slane %v1619_v7, 7  ;;  %vm1699_vm15 = vcmask 293888  }
 0x4b3   : > { %1573 = vrot.lane.b32.xlu1 %v1571_v3, %s2159_s11  ;;  %v1658_v45 = vpop.permute.xlu0 %1657  ;;  %v1608_v62 = vmul.f32 %v1606_v9, %v2756_v63 }
 0x4b4   : > { %v1622_v10 = vsel %vm1621_vm14, %v1620_v12, %v1619_v7  ;;  %v1659_v15 = vrot.slane %v1658_v45, 7  ;;  %vm1302_vm14 = vcmask 1014784  }
 0x4b5   : > { %v1681_v16 = vpop.permute.xlu1 %1680  ;;  %1596 = vrot.lane.b32.xlu0 %v1594_v13, %s2160_s16  ;;  %v1624_v4 = vmul.f32 %v1622_v10, %v2756_v63  ;;  %s1788_s16 = scalar_lea.hbm %s2855_s6, %s1932_s29 }
 0x4b6   : > { %v1661_v17 = vsel %vm1660_vm3, %v1659_v15, %v1658_v45  ;;  %v1682_v11 = vrot.slane %v1681_v16, 7  ;;  %vm1668_vm3 = vcmask 457728  }
 0x4b7   : > { %1610 = vrot.lane.b32.xlu1 %v1608_v62, %s2161_s17  ;;  %v1697_v18 = vpop.permute.xlu0 %1696  ;;  %v1663_v20 = vmul.f32 %v1661_v17, %v2756_v63  ;;  %s1776_s17 = scalar_lea.sflag [#allocation7], %s253_s19 }
 0x4b8   : > { %v1684_v14 = vsel %vm1683_vm5, %v1682_v11, %v1681_v16  ;;  %v1698_v19 = vrot.slane %v1697_v18, 7  ;;  %vm1691_vm5 = vcmask 449536  }
 0x4b9   : > { %v1713_v5 = vpop.permute.xlu1 %1712  ;;  %1626 = vrot.lane.b32.xlu0 %v1624_v4, %s2162_s13  ;;  %v1686_v6 = vmul.f32 %v1684_v14, %v2756_v63  ;;  %s2057_s13 = scalar_lea.vmem %s1791_s10, 48 }
 0x4ba   : > { %v1700_v22 = vsel %vm1699_vm15, %v1698_v19, %v1697_v18  ;;  %v1714_v23 = vrot.slane %v1713_v5, 7  ;;  %vm1723_vm15 = vcmask 433152   ;;  %p2058_p6 = scmp.ne.s32.totalorder %s1791_s10, %s2057_s13 }
 0x4bb   : > { %1665 = vrot.lane.b32.xlu1 %v1663_v20, %s2163_s18  ;;  %v1756_v24 = vpop.permute.xlu0 %1755  ;;  %v1702_v28 = vmul.f32 %v1700_v22, %v2756_v63  ;;  %s2061_s18 = sshll.u32 %s2168_s25, 4  ;;  %s2062_s18 = int_to_ptr.vmem [resolvable:$false] %s2061_s18 }
 0x4bc   : > { %v1716_v25 = vsel %vm1715_vm6, %v1714_v23, %v1713_v5  ;;  %v1757_v26 = vrot.slane %v1756_v24, 7  ;;  %vm1766_vm6 = vcmask 424960   ;;  %p2059_p9 = pnand %p2058_p6, %p2242_p5  ;;  %p2064_p11 = scmp.lt.s32.totalorder %s1791_s10, %s2062_s18 }
 0x4bd   : > { %1688 = vrot.lane.b32.xlu0 %v1686_v6, %s2164_s14  ;;  %v1718_v30 = vmul.f32 %v1716_v25, %v2756_v63  ;;  %v1209_v34 = vpop.permute.xlu1 %1208  ;;  %s2063_s14 = scalar_lea.vmem %s2062_s18, 96 }
 0x4be   : > { %v1759_v29 = vsel %vm1758_vm8, %v1757_v26, %v1756_v24  ;;  %v1210_v37 = vrot.slane %v1209_v34, 1  ;;  %vm1772_vm8 = vcmp.lt.s32.totalorder %v290_v0, 384  ;;  %p2060_p10 = pneg %p2059_p9  ;;  %p2065_p12 = scmp.lt.s32.totalorder %s2063_s14, %s2057_s13 }
 0x4bf   : > { %1704 = vrot.lane.b32.xlu1 %v1702_v28, %s2165_s20  ;;  %v1761_v32 = vmul.f32 %v1759_v29, %v2756_v63 }
 0x4c0   : > { %v1211_v39 = vsel %vm457_vm11, %v1209_v34, %v1210_v37  ;;  %p2066_p13 = por %p2065_p12, %p2064_p11 }
 0x4c1   : > { %1720 = vrot.lane.b32.xlu0 %v1718_v30, %s2166_s26  ;;  %v1213_v43 = vmul.f32 %v1211_v39, %v1179_v36 }
 0x4c2   : > { %p2067_p0 = pnand %p2066_p13, %p2060_p10 }
 0x4c3   : > { %1763 = vrot.lane.b32.xlu1 %v1761_v32, %s2167_s15 }
 0x507   : > { %v1232_v40 = vpop.permute.xlu0 %1231 }
 0x508   : > { %v1233_v41 = vrot.slane %v1232_v40, 1 }
 0x509   : > { %v1246_v44 = vpop.permute.xlu1 %1245 }
 0x50a   : > { %v1234_v46 = vsel %vm318_vm0, %v1232_v40, %v1233_v41  ;;  %v1247_v47 = vrot.slane %v1246_v44, 1  ;;  %vm1394_vm0 = vcmask 875520  }
 0x50b   : > { %v1236_v8 = vadd.f32 %v1234_v46, %v1213_v43  ;;  %v1261_v21 = vpop.permute.xlu0 %1260 }
 0x50c   : > { %v1248_v63 = vsel %vm334_vm1, %v1246_v44, %v1247_v47  ;;  %v1262_v27 = vrot.slane %v1261_v21, 1  ;;  %vm1417_vm1 = vcmask 867328  }
 0x50d   : > { %v1250_v38 = vadd.f32 %v1248_v63, %v1236_v8  ;;  %v1300_v31 = vpop.permute.xlu1 %1299 }
 0x50e   : > { %v1264_v48 = vsel %vm1263_vm10, %v1261_v21, %v1262_v27  ;;  %v1301_v35 = vrot.slane %v1300_v31, 1 }
 0x50f   : > { %v1266_v42 = vadd.f32 %v1264_v48, %v1250_v38  ;;  %v1322_v49 = vpop.permute.xlu0 %1321 }
 0x510   : > { %v1303_v50 = vsel %vm1302_vm14, %v1300_v31, %v1301_v35  ;;  %v1323_v51 = vrot.slane %v1322_v49, 1 }
 0x511   : > { %v1305_v52 = vadd.f32 %v1303_v50, %v1266_v42  ;;  %v1336_v2 = vpop.permute.xlu1 %1335 }
 0x512   : > { %v1324_v53 = vsel %vm350_vm4, %v1322_v49, %v1323_v51  ;;  %v1337_v54 = vrot.slane %v1336_v2, 1  ;;  %vm1501_vm4 = vcmask 728064  }
 0x513   : > { %v1326_v55 = vadd.f32 %v1324_v53, %v1305_v52  ;;  %v1350_v56 = vpop.permute.xlu0 %1349 }
 0x514   : > { %v1338_v57 = vsel %vm377_vm7, %v1336_v2, %v1337_v54  ;;  %v1351_v58 = vrot.slane %v1350_v56, 1  ;;  %vm1517_vm7 = vcmask 719872  }
 0x515   : > { %v1340_v59 = vadd.f32 %v1338_v57, %v1326_v55  ;;  %v1392_v33 = vpop.permute.xlu1 %1391 }
 0x516   : > { %v1352_v60 = vsel %vm409_vm9, %v1350_v56, %v1351_v58  ;;  %v1393_v1 = vrot.slane %v1392_v33, 1  ;;  %vm1533_vm9 = vcmask 605184  }
 0x517   : > { %v1354_v61 = vadd.f32 %v1352_v60, %v1340_v59  ;;  %v1415_v3 = vpop.permute.xlu0 %1414 }
 0x518   : > { %v1395_v7 = vsel %vm1394_vm0, %v1392_v33, %v1393_v1  ;;  %v1416_v9 = vrot.slane %v1415_v3, 1 }
 0x519   : > { %v1397_v12 = vadd.f32 %v1395_v7, %v1354_v61  ;;  %v1430_v13 = vpop.permute.xlu1 %1429 }
 0x51a   : > { %v1418_v45 = vsel %vm1417_vm1, %v1415_v3, %v1416_v9  ;;  %v1431_v10 = vrot.slane %v1430_v13, 1 }
 0x51b   : > { %v1420_v15 = vadd.f32 %v1418_v45, %v1397_v12  ;;  %v1444_v62 = vpop.permute.xlu0 %1443 }
 0x51c   : > { %v1432_v16 = vsel %vm425_vm12, %v1430_v13, %v1431_v10  ;;  %v1445_v17 = vrot.slane %v1444_v62, 1  ;;  %vm1576_vm12 = vcmask 596992  }
 0x51d   : > { %v1434_v11 = vadd.f32 %v1432_v16, %v1420_v15  ;;  %v1477_v4 = vpop.permute.xlu1 %1476 }
 0x51e   : > { %v1446_v18 = vsel %vm441_vm13, %v1444_v62, %v1445_v17  ;;  %v1478_v14 = vrot.slane %v1477_v4, 1  ;;  %vm1629_vm13 = vcmask 572416  }
 0x51f   : > { %v1448_v19 = vadd.f32 %v1446_v18, %v1434_v11  ;;  %v1499_v20 = vpop.permute.xlu0 %1498 }
 0x520   : > { %v1479_v5 = vsel %vm457_vm11, %v1477_v4, %v1478_v14  ;;  %v1500_v22 = vrot.slane %v1499_v20, 1  ;;  %vm1613_vm11 = vcmask 580608  }
 0x521   : > { %v1481_v23 = vadd.f32 %v1479_v5, %v1448_v19  ;;  %v1515_v6 = vpop.permute.xlu1 %1514 }
 0x522   : > { %v1502_v24 = vsel %vm1501_vm4, %v1499_v20, %v1500_v22  ;;  %v1516_v25 = vrot.slane %v1515_v6, 1 }
 0x523   : > { %v1504_v26 = vadd.f32 %v1502_v24, %v1481_v23  ;;  %v1531_v28 = vpop.permute.xlu0 %1530 }
 0x524   : > { %v1518_v29 = vsel %vm1517_vm7, %v1515_v6, %v1516_v25  ;;  %v1532_v30 = vrot.slane %v1531_v28, 1 }
 0x525   : > { %v1520_v32 = vadd.f32 %v1518_v29, %v1504_v26  ;;  %v1574_v34 = vpop.permute.xlu1 %1573 }
 0x526   : > { %v1534_v37 = vsel %vm1533_vm9, %v1531_v28, %v1532_v30  ;;  %v1575_v36 = vrot.slane %v1574_v34, 1 }
 0x527   : > { %v1536_v39 = vadd.f32 %v1534_v37, %v1520_v32  ;;  %v1597_v40 = vpop.permute.xlu0 %1596 }
 0x528   : > { %v1577_v41 = vsel %vm1576_vm12, %v1574_v34, %v1575_v36  ;;  %v1598_v43 = vrot.slane %v1597_v40, 1 }
 0x529   : > { %v1579_v44 = vadd.f32 %v1577_v41, %v1536_v39  ;;  %v1611_v46 = vpop.permute.xlu1 %1610 }
 0x52a   : > { %v1599_v47 = vsel %vm964_vm2, %v1597_v40, %v1598_v43  ;;  %v1612_v8 = vrot.slane %v1611_v46, 1  ;;  %vm1707_vm2 = vcmask 441344  }
 0x52b   : > { %v1601_v21 = vadd.f32 %v1599_v47, %v1579_v44  ;;  %v1627_v63 = vpop.permute.xlu0 %1626 }
 0x52c   : > { %v1614_v27 = vsel %vm1613_vm11, %v1611_v46, %v1612_v8  ;;  %v1628_v38 = vrot.slane %v1627_v63, 1 }
 0x52d   : > { %v1616_v31 = vadd.f32 %v1614_v27, %v1601_v21  ;;  %v1666_v48 = vpop.permute.xlu1 %1665 }
 0x52e   : > { %v1630_v35 = vsel %vm1629_vm13, %v1627_v63, %v1628_v38  ;;  %v1667_v42 = vrot.slane %v1666_v48, 1 }
 0x52f   : > { %v1632_v49 = vadd.f32 %v1630_v35, %v1616_v31  ;;  %v1689_v50 = vpop.permute.xlu0 %1688 }
 0x530   : > { %v1669_v51 = vsel %vm1668_vm3, %v1666_v48, %v1667_v42  ;;  %v1690_v52 = vrot.slane %v1689_v50, 1 }
 0x531   : > { %v1671_v2 = vadd.f32 %v1669_v51, %v1632_v49  ;;  %v1705_v53 = vpop.permute.xlu1 %1704 }
 0x532   : > { %v1692_v54 = vsel %vm1691_vm5, %v1689_v50, %v1690_v52  ;;  %v1706_v55 = vrot.slane %v1705_v53, 1 }
 0x533   : > { %v1694_v56 = vadd.f32 %v1692_v54, %v1671_v2  ;;  %v1721_v57 = vpop.permute.xlu0 %1720 }
 0x534   : > { %v1708_v58 = vsel %vm1707_vm2, %v1705_v53, %v1706_v55  ;;  %v1722_v59 = vrot.slane %v1721_v57, 1 }
 0x535   : > { %v1710_v33 = vadd.f32 %v1708_v58, %v1694_v56  ;;  %v1764_v60 = vpop.permute.xlu1 %1763 }
 0x536   : > { %v1724_v1 = vsel %vm1723_vm15, %v1721_v57, %v1722_v59  ;;  %v1765_v61 = vrot.slane %v1764_v60, 1 }
 0x537   : > { %v1726_v3 = vadd.f32 %v1724_v1, %v1710_v33 }
 0x538   : > { %v1767_v7 = vsel %vm1766_vm6, %v1764_v60, %v1765_v61 }
 0x539   : > { %v1769_v9 = vadd.f32 %v1767_v7, %v1726_v3 }
 0x53b   : > { %1774 = vst.msk [vmem:[%s255_s9] sm:$0x7] %vm1772_vm8, %v1769_v9 }
 0x53c   : > { %2070 = shalt.err (!%p2067_p0)
}
 0x53d   : > { %s2071_s20 = scalar_lea.hbm %s1788_s16, 48  ;;  %s2075_s19 = scalar_lea.hbm %s2855_s6, 96 }
 0x53e   : > { %p2072_p1 = scmp.ne.s32.totalorder %s1788_s16, %s2071_s20  ;;  %p2076_p4 = scmp.lt.s32.totalorder %s1788_s16, %s2855_s6 }
 0x53f   : > { %p2077_p7 = scmp.lt.s32.totalorder %s2075_s19, %s2071_s20 }
 0x540   : > { %p2073_p2 = pnand %p2072_p1, %p2242_p5 }
 0x541   : > { %p2078_p8 = por %p2077_p7, %p2076_p4 }
 0x542   : > { %p2074_p3 = pneg %p2073_p2 }
 0x544   : > { %p2079_p6 = pnand %p2078_p8, %p2074_p3 }
 0x546   : > { %2082 = shalt.err (!%p2079_p6)
}
 0x547   : > { %1937 = dma.vmem_to_hbm [thread:$0]  (%p2242_p5), %s1791_s10, 48, %s1788_s16, %s1776_s17  }
 0x548 PF: > { %p1949_p9 = scmp.ge.s32.totalorder %s2121_s24, 2  ;;  %s1802_s9 = sand.u32 1, %s2109_s21  }
 0x549   : > { %p2868_p10 = scmp.ne.s32.totalorder %s2863_s8, 0  ;;  %s1803_s12 = scalar_lea.sflag [#allocation7], %s1802_s9 }
 0x54b   : > { %p1944_p11 = pnand %p1949_p9, %p2868_p10 }
 0x54d   : > { %p1945_p12 = pneg %p1944_p11 }
 0x54f   : > { %2104 = dma.done.wait (%p1945_p12), %s1803_s12, 48  }
 0x550   : > { %2106 = vsyncadd (%p1945_p12), %s1803_s12, 4294967248  ;;  %p17_p13 = scmp.ge.s32.totalorder %s2229_s27, 4   ;;  %s2869_s21 = smov %s2113_s22 }
 0x551   : > { %s2870_s22 = smov %s2117_s23  ;;  %s2871_s23 = smov %s2240_s30 }
 0x552   : > { %s2872_s24 = smov %s2229_s27  ;;  %19 = sbr.rel (!%p17_p13) target bundleno = 4 (0x4), region = 84 }
 0x557   :  { %1808 = vsyncpa [#allocation6], 1 }
 0x558   :  { %1810 = vsyncpa [#allocation6 + $0x1], 1 }
 0x559   :  { %1811 = vsyncpa [#allocation7], 1 }
 0x55a   :  { %1813 = vsyncpa [#allocation7 + $0x1], 1 }

</bundles_post_ra>
